<compile_context>
chip_gen: v6e
topology: v6e:2x2x1
jax: 0.10.0
libtpu: 0.0.40
codegen_flags: <defaults>
</compile_context>

<pallas_src>
import functools

import jax
import jax.numpy as jnp
from jax.experimental import pallas as pl
from jax.experimental.pallas import tpu as pltpu

_LN_EPS = 1e-5            # nn.LayerNorm default
_SQRT_HALF = 0.7071067811865476
_VMEM_LIMIT = 48 * 1024 * 1024   # above v5e/v6e scoped defaults, below v7x 64 MiB physical


def _cp(dims):
    return pltpu.CompilerParams(dimension_semantics=dims,
                                vmem_limit_bytes=_VMEM_LIMIT)


# ----------------------------- in-kernel math helpers -----------------------------

def _erf_approx(x):
    # Abramowitz & Stegun 7.1.26 rational approximation, |err| < 1.5e-7 (far below the
    # bf16-operand matmul noise).  Uses only exp + arithmetic so it always lowers on Mosaic.
    a1, a2, a3, a4, a5 = 0.254829592, -0.284496736, 1.421413741, -1.453152027, 1.061405429
    p = 0.3275911
    z = jnp.abs(x)
    t = 1.0 / (1.0 + p * z)
    poly = ((((a5 * t + a4) * t + a3) * t + a2) * t + a1) * t
    e = 1.0 - poly * jnp.exp(-z * z)
    return jnp.where(x < 0.0, -e, e)


def _gelu_exact(x):
    # erf-based GELU, matches torch.nn.GELU() (default, non-tanh) to ~1e-7.
    return x * 0.5 * (1.0 + _erf_approx(x * _SQRT_HALF))


def _layernorm(x, g, b, eps):
    mean = jnp.mean(x, axis=-1, keepdims=True)
    c = x - mean
    var = jnp.mean(c * c, axis=-1, keepdims=True)
    return c * jax.lax.rsqrt(var + eps) * g + b


# ----------------------------- kernel bodies -----------------------------

def _patch_embed_kernel(p_ref, w_ref, b_ref, pos_ref, o_ref):
    # tokens = patches @ W' + b' + (pos[:,1:] + pos[:,:1])   (preprocess folded into W', b')
    o_ref[0] = (
        jnp.dot(p_ref[0], w_ref[...], preferred_element_type=jnp.float32)
        + b_ref[...]
        + pos_ref[0]
    ).astype(o_ref.dtype)


def _ln_attn_kernel(x_ref, g_ref, bln_ref, wqkv_ref, bqkv_ref, wp_ref, bp_ref, o_ref, *,
                    num_heads, scale, eps):
    # Fused: LN1 -> QKV matmul -> multi-head attention -> out-proj -> + residual.
    # qkv lives only in VMEM/vregs; the out-proj is ONE full-K matmul over the
    # concatenated per-head context vectors.
    xf = x_ref[0].astype(jnp.float32)                               # [N, E]
    h = _layernorm(xf, g_ref[...], bln_ref[...], eps)
    qkv = (jnp.dot(h.astype(jnp.bfloat16), wqkv_ref[...],
                   preferred_element_type=jnp.float32)
           + bqkv_ref[...]).astype(jnp.bfloat16)                    # [N, 3E] bf16
    E = xf.shape[-1]
    Dh = E // num_heads
    heads = []
    for hh in range(num_heads):
        lo, hi = hh * Dh, (hh + 1) * Dh
        q = qkv[:, lo:hi]
        k = qkv[:, E + lo:E + hi]
        v = qkv[:, 2 * E + lo:2 * E + hi]
        # contract the Dh axis directly (no k.T materialization)
        s = jax.lax.dot_general(q, k, (((1,), (1,)), ((), ())),
                                preferred_element_type=jnp.float32) * scale   # [N, N]
        s = s - jnp.max(s, axis=-1, keepdims=True)
        p = jnp.exp(s)
        p = p * pl.reciprocal(jnp.sum(p, axis=-1, keepdims=True), approx=True)
        heads.append(jnp.dot(p.astype(jnp.bfloat16), v,
                             preferred_element_type=jnp.float32).astype(jnp.bfloat16))
    pv_all = jnp.concatenate(heads, axis=-1)                        # [N, E] bf16
    out = xf + bp_ref[...] + jnp.dot(pv_all, wp_ref[...],
                                     preferred_element_type=jnp.float32)
    o_ref[0] = out.astype(o_ref.dtype)


def _ln_mlp_kernel(x_ref, g_ref, bln_ref, w1_ref, b1_ref, w2_ref, b2_ref, o_ref,
                   lnx_ref, acc_ref, *, eps):
    # x + fc2(GELU(fc1(LN(x)))) with the hidden dim streamed in chunks (grid axis 2).
    # LN(x) is computed once per (batch, token-tile) into bf16 scratch; the f32 scratch
    # accumulates residual + per-chunk partial outputs; output written on the last chunk.
    k = pl.program_id(2)

    @pl.when(k == 0)
    def _():
        xf = x_ref[0].astype(jnp.float32)
        lnx_ref[...] = _layernorm(xf, g_ref[...], bln_ref[...], eps).astype(jnp.bfloat16)
        acc_ref[...] = xf + b2_ref[...]

    h = jnp.dot(lnx_ref[...], w1_ref[...],
                preferred_element_type=jnp.float32) + b1_ref[...]
    h = _gelu_exact(h)
    acc_ref[...] += jnp.dot(h.astype(jnp.bfloat16), w2_ref[...],
                            preferred_element_type=jnp.float32)

    @pl.when(k == pl.num_programs(2) - 1)
    def _():
        o_ref[0] = acc_ref[...].astype(o_ref.dtype)


def _ln_meanpool_kernel(x_ref, g_ref, b_ref, o_ref, *, eps):
    # last LayerNorm + mean over tokens (== mean over (Hp, Wp) of [B, E, Hp, Wp])
    y = _layernorm(x_ref[0].astype(jnp.float32), g_ref[...], b_ref[...], eps)
    o_ref[0] = jnp.mean(y, axis=0, keepdims=True)


# ----------------------------- pallas_call wrappers -----------------------------

def _token_tile(n):
    return 128 if n % 128 == 0 else n


def patch_embed_pos(patches, wmat, bias, pos_tok):
    B, Np, Cpp = patches.shape
    E = wmat.shape[1]
    tn = _token_tile(Np)
    return pl.pallas_call(
        _patch_embed_kernel,
        grid=(B, Np // tn),
        in_specs=[
            pl.BlockSpec((1, tn, Cpp), lambda b, n: (b, n, 0)),
            pl.BlockSpec((Cpp, E), lambda b, n: (0, 0)),
            pl.BlockSpec((1, E), lambda b, n: (0, 0)),
            pl.BlockSpec((1, tn, E), lambda b, n: (0, n, 0)),
        ],
        out_specs=pl.BlockSpec((1, tn, E), lambda b, n: (b, n, 0)),
        out_shape=jax.ShapeDtypeStruct((B, Np, E), jnp.bfloat16),
        compiler_params=_cp(("parallel", "parallel")),
    )(patches, wmat, bias, pos_tok)


def attn_block(x, g, bln, wqkv, bqkv, wp, bp, num_heads):
    B, N, E = x.shape
    three_e = wqkv.shape[1]
    scale = float(E // num_heads) ** -0.5
    # TODO(synk): for v7x at B=1, add a second parallel grid axis over head groups with a
    # partial-output reduction so both TensorCores work on this kernel as well.
    return pl.pallas_call(
        functools.partial(_ln_attn_kernel, num_heads=num_heads, scale=scale, eps=_LN_EPS),
        grid=(B,),
        in_specs=[
            pl.BlockSpec((1, N, E), lambda b: (b, 0, 0)),
            pl.BlockSpec((1, E), lambda b: (0, 0)),
            pl.BlockSpec((1, E), lambda b: (0, 0)),
            pl.BlockSpec((E, three_e), lambda b: (0, 0)),
            pl.BlockSpec((1, three_e), lambda b: (0, 0)),
            pl.BlockSpec((E, E), lambda b: (0, 0)),
            pl.BlockSpec((1, E), lambda b: (0, 0)),
        ],
        out_specs=pl.BlockSpec((1, N, E), lambda b: (b, 0, 0)),
        out_shape=jax.ShapeDtypeStruct((B, N, E), jnp.bfloat16),
        compiler_params=_cp(("parallel",)),
    )(x, g, bln, wqkv, bqkv, wp, bp)


def ln_mlp(x, g, bln, w1, b1, w2, b2, *, hidden_chunk=512):
    B, N, E = x.shape
    Hd = w1.shape[1]
    tn = _token_tile(N)
    ck = hidden_chunk if (Hd % hidden_chunk == 0) else Hd
    ck = min(ck, Hd)
    return pl.pallas_call(
        functools.partial(_ln_mlp_kernel, eps=_LN_EPS),
        grid=(B, N // tn, Hd // ck),
        in_specs=[
            pl.BlockSpec((1, tn, E), lambda b, n, k: (b, n, 0)),
            pl.BlockSpec((1, E), lambda b, n, k: (0, 0)),
            pl.BlockSpec((1, E), lambda b, n, k: (0, 0)),
            pl.BlockSpec((E, ck), lambda b, n, k: (0, k)),
            pl.BlockSpec((1, ck), lambda b, n, k: (0, k)),
            pl.BlockSpec((ck, E), lambda b, n, k: (k, 0)),
            pl.BlockSpec((1, E), lambda b, n, k: (0, 0)),
        ],
        out_specs=pl.BlockSpec((1, tn, E), lambda b, n, k: (b, n, 0)),
        out_shape=jax.ShapeDtypeStruct((B, N, E), jnp.bfloat16),
        scratch_shapes=[
            pltpu.VMEM((tn, E), jnp.bfloat16),   # LN(x), computed once per (b, token tile)
            pltpu.VMEM((tn, E), jnp.float32),    # residual + MLP partial-sum accumulator
        ],
        compiler_params=_cp(("parallel", "parallel", "arbitrary")),
    )(x, g, bln, w1, b1, w2, b2)


def ln_meanpool(x, g, b):
    B, N, E = x.shape
    out = pl.pallas_call(
        functools.partial(_ln_meanpool_kernel, eps=_LN_EPS),
        grid=(B,),
        in_specs=[
            pl.BlockSpec((1, N, E), lambda b: (b, 0, 0)),
            pl.BlockSpec((1, E), lambda b: (0, 0)),
            pl.BlockSpec((1, E), lambda b: (0, 0)),
        ],
        out_specs=pl.BlockSpec((1, 1, E), lambda b: (b, 0, 0)),
        out_shape=jax.ShapeDtypeStruct((B, 1, E), jnp.float32),
        compiler_params=_cp(("parallel",)),
    )(x, g, b)
    return out.reshape(B, E)


# ----------------------------- model glue -----------------------------

def extract_patches(x, patch, pad):
    # im2col for Conv2d(k=patch, s=patch, padding=pad).  Pad with -1 so that the folded
    # preprocess (x+1)/2 maps the padding to exactly 0, matching PyTorch's zero padding
    # applied *after* preprocessing.  Pure one-time layout op on the small input image.
    B, C, H, W = x.shape
    Hp = (H + 2 * pad - patch) // patch + 1
    Wp = (W + 2 * pad - patch) // patch + 1
    xp = jnp.pad(x, ((0, 0), (0, 0), (pad, pad), (pad, pad)), constant_values=-1.0)
    xp = xp[:, :, : Hp * patch, : Wp * patch]
    patches = (
        xp.reshape(B, C, Hp, patch, Wp, patch)
        .transpose(0, 2, 4, 1, 3, 5)                  # [B, Hp, Wp, C, p, p]
        .reshape(B, Hp * Wp, C * patch * patch)
    )
    return patches.astype(jnp.bfloat16), (Hp, Wp)


def prepare_params(params, cfg):
    """One-time host-side prep: fold preprocess into the conv, pre-add pos terms,
    reshape biases to [1, D], and cast all matmul weights to bf16."""
    E = cfg["embed_dim"]
    C = cfg["in_chans"]
    p = cfg["patch_size"]
    hidden = int(E * cfg["mlp_ratio"])

    w = params["patch_w"]                                         # [E, C, p, p]
    wmat = (w * 0.5).reshape(E, C * p * p).T                      # fold (x+1)/2: w/2
    bias = params["patch_b"] + 0.5 * w.reshape(E, -1).sum(-1)     # ... and b + 0.5*sum(w)
    pos = params["pos_embed"]
    pos_tok = pos[:, 1:] + pos[:, :1]                             # [1, N, E]

    prepped = {
        "patch_w": wmat.astype(jnp.bfloat16),
        "patch_b": bias.reshape(1, E).astype(jnp.float32),
        "pos_tok": pos_tok.astype(jnp.float32),
        "last_ln_g": params["last_ln_g"].reshape(1, E),
        "last_ln_b": params["last_ln_b"].reshape(1, E),
        "blocks": [],
    }
    for blk in params["blocks"]:
        prepped["blocks"].append({
            "ln1_g": blk["ln1_g"].reshape(1, E),
            "ln1_b": blk["ln1_b"].reshape(1, E),
            "qkv_w": blk["qkv_w"].astype(jnp.bfloat16),
            "qkv_b": blk["qkv_b"].reshape(1, 3 * E),
            "proj_w": blk["proj_w"].astype(jnp.bfloat16),
            "proj_b": blk["proj_b"].reshape(1, E),
            "ln2_g": blk["ln2_g"].reshape(1, E),
            "ln2_b": blk["ln2_b"].reshape(1, E),
            "fc1_w": blk["fc1_w"].astype(jnp.bfloat16),
            "fc1_b": blk["fc1_b"].reshape(1, hidden),
            "fc2_w": blk["fc2_w"].astype(jnp.bfloat16),
            "fc2_b": blk["fc2_b"].reshape(1, E),
        })
    return prepped


def vit_backbone_forward(x, params, cfg):
    # TODO(synk): the bilinear-resize branch of preprocess_image is not implemented;
    # inputs are assumed to already be at cfg["image_size"].
    patches, _ = extract_patches(x, cfg["patch_size"], cfg["patch_pad"])
    tokens = patch_embed_pos(patches, params["patch_w"], params["patch_b"],
                             params["pos_tok"])                    # [B, N, E] bf16
    for blk in params["blocks"]:
        tokens = attn_block(tokens, blk["ln1_g"], blk["ln1_b"],
                            blk["qkv_w"], blk["qkv_b"],
                            blk["proj_w"], blk["proj_b"], cfg["num_heads"])
        tokens = ln_mlp(tokens, blk["ln2_g"], blk["ln2_b"],
                        blk["fc1_w"], blk["fc1_b"], blk["fc2_w"], blk["fc2_b"])
    return ln_meanpool(tokens, params["last_ln_g"], params["last_ln_b"])   # [B, E] f32


def init_params(key, cfg):
    E = cfg["embed_dim"]
    C = cfg["in_chans"]
    p = cfg["patch_size"]
    hidden = int(E * cfg["mlp_ratio"])
    Hp = (cfg["image_size"] + 2 * cfg["patch_pad"] - p) // p + 1
    N = Hp * Hp
    keys = jax.random.split(key, 2 + cfg["depth"])

    def w_init(k, shape):
        return jax.random.normal(k, shape, jnp.float32) * 0.02

    params = {
        "patch_w": w_init(keys[0], (E, C, p, p)),
        "patch_b": jnp.zeros((E,), jnp.float32),
        "pos_embed": w_init(keys[1], (1, N + 1, E)),
        "last_ln_g": jnp.ones((E,), jnp.float32),
        "last_ln_b": jnp.zeros((E,), jnp.float32),
        "blocks": [],
    }
    for d in range(cfg["depth"]):
        ks = jax.random.split(keys[2 + d], 4)
        params["blocks"].append({
            "ln1_g": jnp.ones((E,), jnp.float32),
            "ln1_b": jnp.zeros((E,), jnp.float32),
            "qkv_w": w_init(ks[0], (E, 3 * E)),
            "qkv_b": jnp.zeros((3 * E,), jnp.float32),
            "proj_w": w_init(ks[1], (E, E)),
            "proj_b": jnp.zeros((E,), jnp.float32),
            "ln2_g": jnp.ones((E,), jnp.float32),
            "ln2_b": jnp.zeros((E,), jnp.float32),
            "fc1_w": w_init(ks[2], (E, hidden)),
            "fc1_b": jnp.zeros((hidden,), jnp.float32),
            "fc2_w": w_init(ks[3], (hidden, E)),
            "fc2_b": jnp.zeros((E,), jnp.float32),
        })
    return params


if __name__ == "__main__":
    # Scaled-down config (full model: image 256, patch 16, embed 768, depth 12, heads 12).
    # embed_dim / hidden / 3*embed_dim are all multiples of 128 so every kernel block is
    # lane-dense, exactly as in the full-size configuration.
    cfg = dict(
        image_size=64,
        patch_size=16,
        patch_pad=2,       # ViTPose PatchEmbed: padding = 4 + 2*(ratio//2 - 1) = 2 for ratio=1
        in_chans=3,
        embed_dim=128,
        depth=2,
        num_heads=4,
        mlp_ratio=4.0,
    )
    key = jax.random.PRNGKey(0)
    kx, kp = jax.random.split(key)
    x = jax.random.uniform(
        kx, (2, 3, cfg["image_size"], cfg["image_size"]), jnp.float32,
        minval=-1.0, maxval=1.0,
    )
    raw_params = init_params(kp, cfg)
    params = prepare_params(raw_params, cfg)       # one-time: fold preprocess, bf16 weights

    fwd = jax.jit(functools.partial(vit_backbone_forward, cfg=cfg))
    feats = fwd(x, params)
    jax.block_until_ready(feats)
    assert feats.shape == (2, cfg["embed_dim"]) and feats.dtype == jnp.float32
    print("KERNEL_OK")
</pallas_src>

<mosaic_0001>
module attributes {stable_mosaic.version = 11 : i64} {
  func.func @_patch_embed_kernel(%arg0: i32, %arg1: i32, %arg2: memref<1x16x768xbf16, #tpu.memory_space<vmem>>, %arg3: memref<768x128xbf16, #tpu.memory_space<vmem>>, %arg4: memref<1x128xf32, #tpu.memory_space<vmem>>, %arg5: memref<1x16x128xf32, #tpu.memory_space<vmem>>, %arg6: memref<1x16x128xbf16, #tpu.memory_space<vmem>>) attributes {dimension_semantics = [#tpu.dimension_semantics<parallel>, #tpu.dimension_semantics<parallel>], iteration_bounds = array<i64: 2, 1>, scalar_prefetch = 0 : i64, scratch_operands = 0 : i64, tpu.core_type = #tpu.core_type<tc>, window_params = [{transform_indices = @transform_0, window_bounds = array<i64: 1, 16, 768>}, {pipeline_mode = #tpu.pipeline_mode<synchronous>, transform_indices = @transform_1, window_bounds = array<i64: 768, 128>}, {pipeline_mode = #tpu.pipeline_mode<synchronous>, transform_indices = @transform_2, window_bounds = array<i64: 1, 128>}, {transform_indices = @transform_3, window_bounds = array<i64: 1, 16, 128>}, {transform_indices = @transform_4, window_bounds = array<i64: 1, 16, 128>}]} {
    %c0 = arith.constant 0 : index
    %c0_0 = arith.constant 0 : index
    %c0_1 = arith.constant 0 : index
    %0 = vector.load %arg2[%c0, %c0_0, %c0_1] : memref<1x16x768xbf16, #tpu.memory_space<vmem>>, vector<1x16x768xbf16>
    %1 = vector.shape_cast %0 : vector<1x16x768xbf16> to vector<16x768xbf16>
    %c0_2 = arith.constant 0 : index
    %c0_3 = arith.constant 0 : index
    %2 = vector.load %arg3[%c0_2, %c0_3] : memref<768x128xbf16, #tpu.memory_space<vmem>>, vector<768x128xbf16>
    %cst = arith.constant dense<0.000000e+00> : vector<16x128xf32>
    %3 = tpu.matmul %1, %2, %cst {dimension_numbers = #tpu.dot_dimension_numbers<[1], [0], [0], [1], [0, 0, 1, 1], [], []>} : vector<16x768xbf16>, vector<768x128xbf16>, vector<16x128xf32> -> vector<16x128xf32>
    %c0_4 = arith.constant 0 : index
    %c0_5 = arith.constant 0 : index
    %4 = vector.load %arg4[%c0_4, %c0_5] : memref<1x128xf32, #tpu.memory_space<vmem>>, vector<1x128xf32>
    %5 = vector.broadcast %4 : vector<1x128xf32> to vector<16x128xf32>
    %6 = arith.addf %3, %5 : vector<16x128xf32>
    %c0_6 = arith.constant 0 : index
    %c0_7 = arith.constant 0 : index
    %c0_8 = arith.constant 0 : index
    %7 = vector.load %arg5[%c0_6, %c0_7, %c0_8] : memref<1x16x128xf32, #tpu.memory_space<vmem>>, vector<1x16x128xf32>
    %8 = vector.shape_cast %7 : vector<1x16x128xf32> to vector<16x128xf32>
    %9 = arith.addf %6, %8 : vector<16x128xf32>
    %10 = arith.truncf %9 : vector<16x128xf32> to vector<16x128xbf16>
    %c0_9 = arith.constant 0 : index
    %c0_10 = arith.constant 0 : index
    %c0_11 = arith.constant 0 : index
    %11 = vector.load %arg6[%c0_9, %c0_10, %c0_11] : memref<1x16x128xbf16, #tpu.memory_space<vmem>>, vector<1x16x128xbf16>
    %12 = vector.shape_cast %11 : vector<1x16x128xbf16> to vector<16x128xbf16>
    %13 = vector.shape_cast %10 : vector<16x128xbf16> to vector<1x16x128xbf16>
    tpu.vector_store %arg6[%c0_9, %c0_10, %c0_11], %13 {strides = array<i32>} : memref<1x16x128xbf16, #tpu.memory_space<vmem>>, vector<1x16x128xbf16>,
    return
  }
  func.func @transform_0(%arg0: i32, %arg1: i32) -> (i32, i32, i32) {
    %c0_i32 = arith.constant 0 : i32
    %c0_i32_0 = arith.constant 0 : i32
    return %arg0, %arg1, %c0_i32 : i32, i32, i32
  }
  func.func @transform_1(%arg0: i32, %arg1: i32) -> (i32, i32) {
    %c0_i32 = arith.constant 0 : i32
    %c0_i32_0 = arith.constant 0 : i32
    %c0_i32_1 = arith.constant 0 : i32
    return %c0_i32, %c0_i32_0 : i32, i32
  }
  func.func @transform_2(%arg0: i32, %arg1: i32) -> (i32, i32) {
    %c0_i32 = arith.constant 0 : i32
    %c0_i32_0 = arith.constant 0 : i32
    %c0_i32_1 = arith.constant 0 : i32
    return %c0_i32, %c0_i32_0 : i32, i32
  }
  func.func @transform_3(%arg0: i32, %arg1: i32) -> (i32, i32, i32) {
    %c0_i32 = arith.constant 0 : i32
    %c0_i32_0 = arith.constant 0 : i32
    %c0_i32_1 = arith.constant 0 : i32
    return %c0_i32, %arg1, %c0_i32_0 : i32, i32, i32
  }
  func.func @transform_4(%arg0: i32, %arg1: i32) -> (i32, i32, i32) {
    %c0_i32 = arith.constant 0 : i32
    %c0_i32_0 = arith.constant 0 : i32
    return %arg0, %arg1, %c0_i32 : i32, i32, i32
  }
}

module attributes {stable_mosaic.version = 11 : i64} {
  func.func @_ln_attn_kernel(%arg0: i32, %arg1: memref<1x16x128xbf16, #tpu.memory_space<vmem>>, %arg2: memref<1x128xf32, #tpu.memory_space<vmem>>, %arg3: memref<1x128xf32, #tpu.memory_space<vmem>>, %arg4: memref<128x384xbf16, #tpu.memory_space<vmem>>, %arg5: memref<1x384xf32, #tpu.memory_space<vmem>>, %arg6: memref<128x128xbf16, #tpu.memory_space<vmem>>, %arg7: memref<1x128xf32, #tpu.memory_space<vmem>>, %arg8: memref<1x16x128xbf16, #tpu.memory_space<vmem>>) attributes {dimension_semantics = [#tpu.dimension_semantics<parallel>], iteration_bounds = array<i64: 2>, scalar_prefetch = 0 : i64, scratch_operands = 0 : i64, tpu.core_type = #tpu.core_type<tc>, window_params = [{transform_indices = @transform_0, window_bounds = array<i64: 1, 16, 128>}, {pipeline_mode = #tpu.pipeline_mode<synchronous>, transform_indices = @transform_1, window_bounds = array<i64: 1, 128>}, {pipeline_mode = #tpu.pipeline_mode<synchronous>, transform_indices = @transform_2, window_bounds = array<i64: 1, 128>}, {pipeline_mode = #tpu.pipeline_mode<synchronous>, transform_indices = @transform_3, window_bounds = array<i64: 128, 384>}, {pipeline_mode = #tpu.pipeline_mode<synchronous>, transform_indices = @transform_4, window_bounds = array<i64: 1, 384>}, {pipeline_mode = #tpu.pipeline_mode<synchronous>, transform_indices = @transform_5, window_bounds = array<i64: 128, 128>}, {pipeline_mode = #tpu.pipeline_mode<synchronous>, transform_indices = @transform_6, window_bounds = array<i64: 1, 128>}, {transform_indices = @transform_7, window_bounds = array<i64: 1, 16, 128>}]} {
    %c0 = arith.constant 0 : index
    %c0_0 = arith.constant 0 : index
    %c0_1 = arith.constant 0 : index
    %0 = vector.load %arg1[%c0, %c0_0, %c0_1] : memref<1x16x128xbf16, #tpu.memory_space<vmem>>, vector<1x16x128xbf16>
    %1 = vector.shape_cast %0 : vector<1x16x128xbf16> to vector<16x128xbf16>
    %2 = arith.extf %1 : vector<16x128xbf16> to vector<16x128xf32>
    %c0_2 = arith.constant 0 : index
    %c0_3 = arith.constant 0 : index
    %3 = vector.load %arg2[%c0_2, %c0_3] : memref<1x128xf32, #tpu.memory_space<vmem>>, vector<1x128xf32>
    %c0_4 = arith.constant 0 : index
    %c0_5 = arith.constant 0 : index
    %4 = vector.load %arg3[%c0_4, %c0_5] : memref<1x128xf32, #tpu.memory_space<vmem>>, vector<1x128xf32>
    %cst = arith.constant dense<0.000000e+00> : vector<16xf32>
    %5 = vector.multi_reduction <add>, %2, %cst [1] : vector<16x128xf32> to vector<16xf32>
    %6 = vector.shape_cast %5 : vector<16xf32> to vector<16x1xf32>
    %cst_6 = arith.constant 1.280000e+02 : f32
    %7 = vector.broadcast %cst_6 : f32 to vector<16x1xf32>
    %8 = arith.divf %6, %7 : vector<16x1xf32>
    %9 = vector.broadcast %8 : vector<16x1xf32> to vector<16x128xf32>
    %10 = arith.subf %2, %9 : vector<16x128xf32>
    %11 = arith.mulf %10, %10 : vector<16x128xf32>
    %cst_7 = arith.constant dense<0.000000e+00> : vector<16xf32>
    %12 = vector.multi_reduction <add>, %11, %cst_7 [1] : vector<16x128xf32> to vector<16xf32>
    %13 = vector.shape_cast %12 : vector<16xf32> to vector<16x1xf32>
    %cst_8 = arith.constant 1.280000e+02 : f32
    %14 = vector.broadcast %cst_8 : f32 to vector<16x1xf32>
    %15 = arith.divf %13, %14 : vector<16x1xf32>
    %cst_9 = arith.constant 9.99999974E-6 : f32
    %16 = vector.broadcast %cst_9 : f32 to vector<16x1xf32>
    %17 = arith.addf %15, %16 : vector<16x1xf32>
    %18 = math.rsqrt %17 : vector<16x1xf32>
    %19 = vector.broadcast %18 : vector<16x1xf32> to vector<16x128xf32>
    %20 = arith.mulf %10, %19 : vector<16x128xf32>
    %21 = vector.broadcast %3 : vector<1x128xf32> to vector<16x128xf32>
    %22 = arith.mulf %20, %21 : vector<16x128xf32>
    %23 = vector.broadcast %4 : vector<1x128xf32> to vector<16x128xf32>
    %24 = arith.addf %22, %23 : vector<16x128xf32>
    %25 = arith.truncf %24 : vector<16x128xf32> to vector<16x128xbf16>
    %c0_10 = arith.constant 0 : index
    %c0_11 = arith.constant 0 : index
    %26 = vector.load %arg4[%c0_10, %c0_11] : memref<128x384xbf16, #tpu.memory_space<vmem>>, vector<128x384xbf16>
    %cst_12 = arith.constant dense<0.000000e+00> : vector<16x384xf32>
    %27 = tpu.matmul %25, %26, %cst_12 {dimension_numbers = #tpu.dot_dimension_numbers<[1], [0], [0], [1], [0, 0, 1, 1], [], []>} : vector<16x128xbf16>, vector<128x384xbf16>, vector<16x384xf32> -> vector<16x384xf32>
    %c0_13 = arith.constant 0 : index
    %c0_14 = arith.constant 0 : index
    %28 = vector.load %arg5[%c0_13, %c0_14] : memref<1x384xf32, #tpu.memory_space<vmem>>, vector<1x384xf32>
    %29 = vector.broadcast %28 : vector<1x384xf32> to vector<16x384xf32>
    %30 = arith.addf %27, %29 : vector<16x384xf32>
    %31 = arith.truncf %30 : vector<16x384xf32> to vector<16x384xbf16>
    %32 = vector.extract_strided_slice %31 {offsets = [0, 0], sizes = [16, 32], strides = [1, 1]} : vector<16x384xbf16> to vector<16x32xbf16>
    %33 = vector.extract_strided_slice %31 {offsets = [0, 128], sizes = [16, 32], strides = [1, 1]} : vector<16x384xbf16> to vector<16x32xbf16>
    %34 = vector.extract_strided_slice %31 {offsets = [0, 256], sizes = [16, 32], strides = [1, 1]} : vector<16x384xbf16> to vector<16x32xbf16>
    %cst_15 = arith.constant dense<0.000000e+00> : vector<16x16xf32>
    %35 = tpu.matmul %32, %33, %cst_15 {dimension_numbers = #tpu.dot_dimension_numbers<[1], [1], [0], [0], [0, 0, 1, 0], [], []>} : vector<16x32xbf16>, vector<16x32xbf16>, vector<16x16xf32> -> vector<16x16xf32>
    %cst_16 = arith.constant 0.176776692 : f32
    %36 = vector.broadcast %cst_16 : f32 to vector<16x16xf32>
    %37 = arith.mulf %35, %36 : vector<16x16xf32>
    %cst_17 = arith.constant dense<0xFF800000> : vector<16xf32>
    %38 = vector.multi_reduction <maximumf>, %37, %cst_17 [1] : vector<16x16xf32> to vector<16xf32>
    %39 = vector.shape_cast %38 : vector<16xf32> to vector<16x1xf32>
    %40 = vector.broadcast %39 : vector<16x1xf32> to vector<16x16xf32>
    %41 = arith.subf %37, %40 : vector<16x16xf32>
    %42 = math.exp %41 : vector<16x16xf32>
    %cst_18 = arith.constant dense<0.000000e+00> : vector<16xf32>
    %43 = vector.multi_reduction <add>, %42, %cst_18 [1] : vector<16x16xf32> to vector<16xf32>
    %44 = vector.shape_cast %43 : vector<16xf32> to vector<16x1xf32>
    %45 = tpu.reciprocal %44 {approx = true} : vector<16x1xf32> -> vector<16x1xf32>
    %46 = vector.broadcast %45 : vector<16x1xf32> to vector<16x16xf32>
    %47 = arith.mulf %42, %46 : vector<16x16xf32>
    %48 = arith.truncf %47 : vector<16x16xf32> to vector<16x16xbf16>
    %cst_19 = arith.constant dense<0.000000e+00> : vector<16x32xf32>
    %49 = tpu.matmul %48, %34, %cst_19 {dimension_numbers = #tpu.dot_dimension_numbers<[1], [0], [0], [1], [0, 0, 1, 1], [], []>} : vector<16x16xbf16>, vector<16x32xbf16>, vector<16x32xf32> -> vector<16x32xf32>
    %50 = arith.truncf %49 : vector<16x32xf32> to vector<16x32xbf16>
    %51 = vector.extract_strided_slice %31 {offsets = [0, 32], sizes = [16, 32], strides = [1, 1]} : vector<16x384xbf16> to vector<16x32xbf16>
    %52 = vector.extract_strided_slice %31 {offsets = [0, 160], sizes = [16, 32], strides = [1, 1]} : vector<16x384xbf16> to vector<16x32xbf16>
    %53 = vector.extract_strided_slice %31 {offsets = [0, 288], sizes = [16, 32], strides = [1, 1]} : vector<16x384xbf16> to vector<16x32xbf16>
    %cst_20 = arith.constant dense<0.000000e+00> : vector<16x16xf32>
    %54 = tpu.matmul %51, %52, %cst_20 {dimension_numbers = #tpu.dot_dimension_numbers<[1], [1], [0], [0], [0, 0, 1, 0], [], []>} : vector<16x32xbf16>, vector<16x32xbf16>, vector<16x16xf32> -> vector<16x16xf32>
    %cst_21 = arith.constant 0.176776692 : f32
    %55 = vector.broadcast %cst_21 : f32 to vector<16x16xf32>
    %56 = arith.mulf %54, %55 : vector<16x16xf32>
    %cst_22 = arith.constant dense<0xFF800000> : vector<16xf32>
    %57 = vector.multi_reduction <maximumf>, %56, %cst_22 [1] : vector<16x16xf32> to vector<16xf32>
    %58 = vector.shape_cast %57 : vector<16xf32> to vector<16x1xf32>
    %59 = vector.broadcast %58 : vector<16x1xf32> to vector<16x16xf32>
    %60 = arith.subf %56, %59 : vector<16x16xf32>
    %61 = math.exp %60 : vector<16x16xf32>
    %cst_23 = arith.constant dense<0.000000e+00> : vector<16xf32>
    %62 = vector.multi_reduction <add>, %61, %cst_23 [1] : vector<16x16xf32> to vector<16xf32>
    %63 = vector.shape_cast %62 : vector<16xf32> to vector<16x1xf32>
    %64 = tpu.reciprocal %63 {approx = true} : vector<16x1xf32> -> vector<16x1xf32>
    %65 = vector.broadcast %64 : vector<16x1xf32> to vector<16x16xf32>
    %66 = arith.mulf %61, %65 : vector<16x16xf32>
    %67 = arith.truncf %66 : vector<16x16xf32> to vector<16x16xbf16>
    %cst_24 = arith.constant dense<0.000000e+00> : vector<16x32xf32>
    %68 = tpu.matmul %67, %53, %cst_24 {dimension_numbers = #tpu.dot_dimension_numbers<[1], [0], [0], [1], [0, 0, 1, 1], [], []>} : vector<16x16xbf16>, vector<16x32xbf16>, vector<16x32xf32> -> vector<16x32xf32>
    %69 = arith.truncf %68 : vector<16x32xf32> to vector<16x32xbf16>
    %70 = vector.extract_strided_slice %31 {offsets = [0, 64], sizes = [16, 32], strides = [1, 1]} : vector<16x384xbf16> to vector<16x32xbf16>
    %71 = vector.extract_strided_slice %31 {offsets = [0, 192], sizes = [16, 32], strides = [1, 1]} : vector<16x384xbf16> to vector<16x32xbf16>
    %72 = vector.extract_strided_slice %31 {offsets = [0, 320], sizes = [16, 32], strides = [1, 1]} : vector<16x384xbf16> to vector<16x32xbf16>
    %cst_25 = arith.constant dense<0.000000e+00> : vector<16x16xf32>
    %73 = tpu.matmul %70, %71, %cst_25 {dimension_numbers = #tpu.dot_dimension_numbers<[1], [1], [0], [0], [0, 0, 1, 0], [], []>} : vector<16x32xbf16>, vector<16x32xbf16>, vector<16x16xf32> -> vector<16x16xf32>
    %cst_26 = arith.constant 0.176776692 : f32
    %74 = vector.broadcast %cst_26 : f32 to vector<16x16xf32>
    %75 = arith.mulf %73, %74 : vector<16x16xf32>
    %cst_27 = arith.constant dense<0xFF800000> : vector<16xf32>
    %76 = vector.multi_reduction <maximumf>, %75, %cst_27 [1] : vector<16x16xf32> to vector<16xf32>
    %77 = vector.shape_cast %76 : vector<16xf32> to vector<16x1xf32>
    %78 = vector.broadcast %77 : vector<16x1xf32> to vector<16x16xf32>
    %79 = arith.subf %75, %78 : vector<16x16xf32>
    %80 = math.exp %79 : vector<16x16xf32>
    %cst_28 = arith.constant dense<0.000000e+00> : vector<16xf32>
    %81 = vector.multi_reduction <add>, %80, %cst_28 [1] : vector<16x16xf32> to vector<16xf32>
    %82 = vector.shape_cast %81 : vector<16xf32> to vector<16x1xf32>
    %83 = tpu.reciprocal %82 {approx = true} : vector<16x1xf32> -> vector<16x1xf32>
    %84 = vector.broadcast %83 : vector<16x1xf32> to vector<16x16xf32>
    %85 = arith.mulf %80, %84 : vector<16x16xf32>
    %86 = arith.truncf %85 : vector<16x16xf32> to vector<16x16xbf16>
    %cst_29 = arith.constant dense<0.000000e+00> : vector<16x32xf32>
    %87 = tpu.matmul %86, %72, %cst_29 {dimension_numbers = #tpu.dot_dimension_numbers<[1], [0], [0], [1], [0, 0, 1, 1], [], []>} : vector<16x16xbf16>, vector<16x32xbf16>, vector<16x32xf32> -> vector<16x32xf32>
    %88 = arith.truncf %87 : vector<16x32xf32> to vector<16x32xbf16>
    %89 = vector.extract_strided_slice %31 {offsets = [0, 96], sizes = [16, 32], strides = [1, 1]} : vector<16x384xbf16> to vector<16x32xbf16>
    %90 = vector.extract_strided_slice %31 {offsets = [0, 224], sizes = [16, 32], strides = [1, 1]} : vector<16x384xbf16> to vector<16x32xbf16>
    %91 = vector.extract_strided_slice %31 {offsets = [0, 352], sizes = [16, 32], strides = [1, 1]} : vector<16x384xbf16> to vector<16x32xbf16>
    %cst_30 = arith.constant dense<0.000000e+00> : vector<16x16xf32>
    %92 = tpu.matmul %89, %90, %cst_30 {dimension_numbers = #tpu.dot_dimension_numbers<[1], [1], [0], [0], [0, 0, 1, 0], [], []>} : vector<16x32xbf16>, vector<16x32xbf16>, vector<16x16xf32> -> vector<16x16xf32>
    %cst_31 = arith.constant 0.176776692 : f32
    %93 = vector.broadcast %cst_31 : f32 to vector<16x16xf32>
    %94 = arith.mulf %92, %93 : vector<16x16xf32>
    %cst_32 = arith.constant dense<0xFF800000> : vector<16xf32>
    %95 = vector.multi_reduction <maximumf>, %94, %cst_32 [1] : vector<16x16xf32> to vector<16xf32>
    %96 = vector.shape_cast %95 : vector<16xf32> to vector<16x1xf32>
    %97 = vector.broadcast %96 : vector<16x1xf32> to vector<16x16xf32>
    %98 = arith.subf %94, %97 : vector<16x16xf32>
    %99 = math.exp %98 : vector<16x16xf32>
    %cst_33 = arith.constant dense<0.000000e+00> : vector<16xf32>
    %100 = vector.multi_reduction <add>, %99, %cst_33 [1] : vector<16x16xf32> to vector<16xf32>
    %101 = vector.shape_cast %100 : vector<16xf32> to vector<16x1xf32>
    %102 = tpu.reciprocal %101 {approx = true} : vector<16x1xf32> -> vector<16x1xf32>
    %103 = vector.broadcast %102 : vector<16x1xf32> to vector<16x16xf32>
    %104 = arith.mulf %99, %103 : vector<16x16xf32>
    %105 = arith.truncf %104 : vector<16x16xf32> to vector<16x16xbf16>
    %cst_34 = arith.constant dense<0.000000e+00> : vector<16x32xf32>
    %106 = tpu.matmul %105, %91, %cst_34 {dimension_numbers = #tpu.dot_dimension_numbers<[1], [0], [0], [1], [0, 0, 1, 1], [], []>} : vector<16x16xbf16>, vector<16x32xbf16>, vector<16x32xf32> -> vector<16x32xf32>
    %107 = arith.truncf %106 : vector<16x32xf32> to vector<16x32xbf16>
    %108 = tpu.concatenate %50, %69, %88, %107 in 1 : vector<16x32xbf16>, vector<16x32xbf16>, vector<16x32xbf16>, vector<16x32xbf16> -> vector<16x128xbf16>
    %c0_35 = arith.constant 0 : index
    %c0_36 = arith.constant 0 : index
    %109 = vector.load %arg7[%c0_35, %c0_36] : memref<1x128xf32, #tpu.memory_space<vmem>>, vector<1x128xf32>
    %110 = vector.broadcast %109 : vector<1x128xf32> to vector<16x128xf32>
    %111 = arith.addf %2, %110 : vector<16x128xf32>
    %c0_37 = arith.constant 0 : index
    %c0_38 = arith.constant 0 : index
    %112 = vector.load %arg6[%c0_37, %c0_38] : memref<128x128xbf16, #tpu.memory_space<vmem>>, vector<128x128xbf16>
    %cst_39 = arith.constant dense<0.000000e+00> : vector<16x128xf32>
    %113 = tpu.matmul %108, %112, %cst_39 {dimension_numbers = #tpu.dot_dimension_numbers<[1], [0], [0], [1], [0, 0, 1, 1], [], []>} : vector<16x128xbf16>, vector<128x128xbf16>, vector<16x128xf32> -> vector<16x128xf32>
    %114 = arith.addf %111, %113 : vector<16x128xf32>
    %115 = arith.truncf %114 : vector<16x128xf32> to vector<16x128xbf16>
    %c0_40 = arith.constant 0 : index
    %c0_41 = arith.constant 0 : index
    %c0_42 = arith.constant 0 : index
    %116 = vector.load %arg8[%c0_40, %c0_41, %c0_42] : memref<1x16x128xbf16, #tpu.memory_space<vmem>>, vector<1x16x128xbf16>
    %117 = vector.shape_cast %116 : vector<1x16x128xbf16> to vector<16x128xbf16>
    %118 = vector.shape_cast %115 : vector<16x128xbf16> to vector<1x16x128xbf16>
    tpu.vector_store %arg8[%c0_40, %c0_41, %c0_42], %118 {strides = array<i32>} : memref<1x16x128xbf16, #tpu.memory_space<vmem>>, vector<1x16x128xbf16>,
    return
  }
  func.func @transform_0(%arg0: i32) -> (i32, i32, i32) {
    %c0_i32 = arith.constant 0 : i32
    %c0_i32_0 = arith.constant 0 : i32
    %c0_i32_1 = arith.constant 0 : i32
    return %arg0, %c0_i32, %c0_i32_0 : i32, i32, i32
  }
  func.func @transform_1(%arg0: i32) -> (i32, i32) {
    %c0_i32 = arith.constant 0 : i32
    %c0_i32_0 = arith.constant 0 : i32
    %c0_i32_1 = arith.constant 0 : i32
    return %c0_i32, %c0_i32_0 : i32, i32
  }
  func.func @transform_2(%arg0: i32) -> (i32, i32) {
    %c0_i32 = arith.constant 0 : i32
    %c0_i32_0 = arith.constant 0 : i32
    %c0_i32_1 = arith.constant 0 : i32
    return %c0_i32, %c0_i32_0 : i32, i32
  }
  func.func @transform_3(%arg0: i32) -> (i32, i32) {
    %c0_i32 = arith.constant 0 : i32
    %c0_i32_0 = arith.constant 0 : i32
    %c0_i32_1 = arith.constant 0 : i32
    return %c0_i32, %c0_i32_0 : i32, i32
  }
  func.func @transform_4(%arg0: i32) -> (i32, i32) {
    %c0_i32 = arith.constant 0 : i32
    %c0_i32_0 = arith.constant 0 : i32
    %c0_i32_1 = arith.constant 0 : i32
    return %c0_i32, %c0_i32_0 : i32, i32
  }
  func.func @transform_5(%arg0: i32) -> (i32, i32) {
    %c0_i32 = arith.constant 0 : i32
    %c0_i32_0 = arith.constant 0 : i32
    %c0_i32_1 = arith.constant 0 : i32
    return %c0_i32, %c0_i32_0 : i32, i32
  }
  func.func @transform_6(%arg0: i32) -> (i32, i32) {
    %c0_i32 = arith.constant 0 : i32
    %c0_i32_0 = arith.constant 0 : i32
    %c0_i32_1 = arith.constant 0 : i32
    return %c0_i32, %c0_i32_0 : i32, i32
  }
  func.func @transform_7(%arg0: i32) -> (i32, i32, i32) {
    %c0_i32 = arith.constant 0 : i32
    %c0_i32_0 = arith.constant 0 : i32
    %c0_i32_1 = arith.constant 0 : i32
    return %arg0, %c0_i32, %c0_i32_0 : i32, i32, i32
  }
}

module attributes {stable_mosaic.version = 11 : i64} {
  func.func @_ln_mlp_kernel(%arg0: i32, %arg1: i32, %arg2: i32, %arg3: memref<1x16x128xbf16, #tpu.memory_space<vmem>>, %arg4: memref<1x128xf32, #tpu.memory_space<vmem>>, %arg5: memref<1x128xf32, #tpu.memory_space<vmem>>, %arg6: memref<128x512xbf16, #tpu.memory_space<vmem>>, %arg7: memref<1x512xf32, #tpu.memory_space<vmem>>, %arg8: memref<512x128xbf16, #tpu.memory_space<vmem>>, %arg9: memref<1x128xf32, #tpu.memory_space<vmem>>, %arg10: memref<1x16x128xbf16, #tpu.memory_space<vmem>>, %arg11: memref<16x128xbf16, #tpu.memory_space<vmem>>, %arg12: memref<16x128xf32, #tpu.memory_space<vmem>>) attributes {dimension_semantics = [#tpu.dimension_semantics<parallel>, #tpu.dimension_semantics<parallel>, #tpu.dimension_semantics<arbitrary>], iteration_bounds = array<i64: 2, 1, 1>, scalar_prefetch = 0 : i64, scratch_operands = 2 : i64, tpu.core_type = #tpu.core_type<tc>, window_params = [{transform_indices = @transform_0, window_bounds = array<i64: 1, 16, 128>}, {pipeline_mode = #tpu.pipeline_mode<synchronous>, transform_indices = @transform_1, window_bounds = array<i64: 1, 128>}, {pipeline_mode = #tpu.pipeline_mode<synchronous>, transform_indices = @transform_2, window_bounds = array<i64: 1, 128>}, {transform_indices = @transform_3, window_bounds = array<i64: 128, 512>}, {transform_indices = @transform_4, window_bounds = array<i64: 1, 512>}, {transform_indices = @transform_5, window_bounds = array<i64: 512, 128>}, {pipeline_mode = #tpu.pipeline_mode<synchronous>, transform_indices = @transform_6, window_bounds = array<i64: 1, 128>}, {transform_indices = @transform_7, window_bounds = array<i64: 1, 16, 128>}]} {
    %c0_i32 = arith.constant 0 : i32
    %0 = arith.cmpi eq, %arg2, %c0_i32 : i32
    %1 = arith.extui %0 : i1 to i32
    %c0_i32_0 = arith.constant 0 : i32
    %2 = arith.cmpi ne, %1, %c0_i32_0 : i32
    scf.if %2 {
      %c0_30 = arith.constant 0 : index
      %c0_31 = arith.constant 0 : index
      %c0_32 = arith.constant 0 : index
      %58 = vector.load %arg3[%c0_30, %c0_31, %c0_32] : memref<1x16x128xbf16, #tpu.memory_space<vmem>>, vector<1x16x128xbf16>
      %59 = vector.shape_cast %58 : vector<1x16x128xbf16> to vector<16x128xbf16>
      %60 = arith.extf %59 : vector<16x128xbf16> to vector<16x128xf32>
      %c0_33 = arith.constant 0 : index
      %c0_34 = arith.constant 0 : index
      %61 = vector.load %arg4[%c0_33, %c0_34] : memref<1x128xf32, #tpu.memory_space<vmem>>, vector<1x128xf32>
      %c0_35 = arith.constant 0 : index
      %c0_36 = arith.constant 0 : index
      %62 = vector.load %arg5[%c0_35, %c0_36] : memref<1x128xf32, #tpu.memory_space<vmem>>, vector<1x128xf32>
      %cst_37 = arith.constant dense<0.000000e+00> : vector<16xf32>
      %63 = vector.multi_reduction <add>, %60, %cst_37 [1] : vector<16x128xf32> to vector<16xf32>
      %64 = vector.shape_cast %63 : vector<16xf32> to vector<16x1xf32>
      %cst_38 = arith.constant 1.280000e+02 : f32
      %65 = vector.broadcast %cst_38 : f32 to vector<16x1xf32>
      %66 = arith.divf %64, %65 : vector<16x1xf32>
      %67 = vector.broadcast %66 : vector<16x1xf32> to vector<16x128xf32>
      %68 = arith.subf %60, %67 : vector<16x128xf32>
      %69 = arith.mulf %68, %68 : vector<16x128xf32>
      %cst_39 = arith.constant dense<0.000000e+00> : vector<16xf32>
      %70 = vector.multi_reduction <add>, %69, %cst_39 [1] : vector<16x128xf32> to vector<16xf32>
      %71 = vector.shape_cast %70 : vector<16xf32> to vector<16x1xf32>
      %cst_40 = arith.constant 1.280000e+02 : f32
      %72 = vector.broadcast %cst_40 : f32 to vector<16x1xf32>
      %73 = arith.divf %71, %72 : vector<16x1xf32>
      %cst_41 = arith.constant 9.99999974E-6 : f32
      %74 = vector.broadcast %cst_41 : f32 to vector<16x1xf32>
      %75 = arith.addf %73, %74 : vector<16x1xf32>
      %76 = math.rsqrt %75 : vector<16x1xf32>
      %77 = vector.broadcast %76 : vector<16x1xf32> to vector<16x128xf32>
      %78 = arith.mulf %68, %77 : vector<16x128xf32>
      %79 = vector.broadcast %61 : vector<1x128xf32> to vector<16x128xf32>
      %80 = arith.mulf %78, %79 : vector<16x128xf32>
      %81 = vector.broadcast %62 : vector<1x128xf32> to vector<16x128xf32>
      %82 = arith.addf %80, %81 : vector<16x128xf32>
      %83 = arith.truncf %82 : vector<16x128xf32> to vector<16x128xbf16>
      %c0_42 = arith.constant 0 : index
      %c0_43 = arith.constant 0 : index
      %84 = vector.load %arg11[%c0_42, %c0_43] : memref<16x128xbf16, #tpu.memory_space<vmem>>, vector<16x128xbf16>
      tpu.vector_store %arg11[%c0_42, %c0_43], %83 {strides = array<i32>} : memref<16x128xbf16, #tpu.memory_space<vmem>>, vector<16x128xbf16>,
      %c0_44 = arith.constant 0 : index
      %c0_45 = arith.constant 0 : index
      %85 = vector.load %arg9[%c0_44, %c0_45] : memref<1x128xf32, #tpu.memory_space<vmem>>, vector<1x128xf32>
      %86 = vector.broadcast %85 : vector<1x128xf32> to vector<16x128xf32>
      %87 = arith.addf %60, %86 : vector<16x128xf32>
      %c0_46 = arith.constant 0 : index
      %c0_47 = arith.constant 0 : index
      %88 = vector.load %arg12[%c0_46, %c0_47] : memref<16x128xf32, #tpu.memory_space<vmem>>, vector<16x128xf32>
      tpu.vector_store %arg12[%c0_46, %c0_47], %87 {strides = array<i32>} : memref<16x128xf32, #tpu.memory_space<vmem>>, vector<16x128xf32>,
    } else {
    }
    %c0 = arith.constant 0 : index
    %c0_1 = arith.constant 0 : index
    %3 = vector.load %arg11[%c0, %c0_1] : memref<16x128xbf16, #tpu.memory_space<vmem>>, vector<16x128xbf16>
    %c0_2 = arith.constant 0 : index
    %c0_3 = arith.constant 0 : index
    %4 = vector.load %arg6[%c0_2, %c0_3] : memref<128x512xbf16, #tpu.memory_space<vmem>>, vector<128x512xbf16>
    %cst = arith.constant dense<0.000000e+00> : vector<16x512xf32>
    %5 = tpu.matmul %3, %4, %cst {dimension_numbers = #tpu.dot_dimension_numbers<[1], [0], [0], [1], [0, 0, 1, 1], [], []>} : vector<16x128xbf16>, vector<128x512xbf16>, vector<16x512xf32> -> vector<16x512xf32>
    %c0_4 = arith.constant 0 : index
    %c0_5 = arith.constant 0 : index
    %6 = vector.load %arg7[%c0_4, %c0_5] : memref<1x512xf32, #tpu.memory_space<vmem>>, vector<1x512xf32>
    %7 = vector.broadcast %6 : vector<1x512xf32> to vector<16x512xf32>
    %8 = arith.addf %5, %7 : vector<16x512xf32>
    %cst_6 = arith.constant 5.000000e-01 : f32
    %9 = vector.broadcast %cst_6 : f32 to vector<16x512xf32>
    %10 = arith.mulf %8, %9 : vector<16x512xf32>
    %cst_7 = arith.constant 0.707106769 : f32
    %11 = vector.broadcast %cst_7 : f32 to vector<16x512xf32>
    %12 = arith.mulf %8, %11 : vector<16x512xf32>
    %13 = math.absf %12 : vector<16x512xf32>
    %cst_8 = arith.constant 0.327591091 : f32
    %14 = vector.broadcast %cst_8 : f32 to vector<16x512xf32>
    %15 = arith.mulf %14, %13 : vector<16x512xf32>
    %cst_9 = arith.constant 1.000000e+00 : f32
    %16 = vector.broadcast %cst_9 : f32 to vector<16x512xf32>
    %17 = arith.addf %16, %15 : vector<16x512xf32>
    %cst_10 = arith.constant 1.000000e+00 : f32
    %18 = vector.broadcast %cst_10 : f32 to vector<16x512xf32>
    %19 = arith.divf %18, %17 : vector<16x512xf32>
    %cst_11 = arith.constant 1.06140542 : f32
    %20 = vector.broadcast %cst_11 : f32 to vector<16x512xf32>
    %21 = arith.mulf %20, %19 : vector<16x512xf32>
    %cst_12 = arith.constant -1.45315206 : f32
    %22 = vector.broadcast %cst_12 : f32 to vector<16x512xf32>
    %23 = arith.addf %21, %22 : vector<16x512xf32>
    %24 = arith.mulf %23, %19 : vector<16x512xf32>
    %cst_13 = arith.constant 1.42141378 : f32
    %25 = vector.broadcast %cst_13 : f32 to vector<16x512xf32>
    %26 = arith.addf %24, %25 : vector<16x512xf32>
    %27 = arith.mulf %26, %19 : vector<16x512xf32>
    %cst_14 = arith.constant -0.284496725 : f32
    %28 = vector.broadcast %cst_14 : f32 to vector<16x512xf32>
    %29 = arith.addf %27, %28 : vector<16x512xf32>
    %30 = arith.mulf %29, %19 : vector<16x512xf32>
    %cst_15 = arith.constant 0.254829586 : f32
    %31 = vector.broadcast %cst_15 : f32 to vector<16x512xf32>
    %32 = arith.addf %30, %31 : vector<16x512xf32>
    %33 = arith.mulf %32, %19 : vector<16x512xf32>
    %cst_16 = arith.constant 0.000000e+00 : f32
    %34 = vector.broadcast %cst_16 : f32 to vector<16x512xf32>
    %35 = arith.subf %34, %13 : vector<16x512xf32>
    %36 = arith.mulf %35, %13 : vector<16x512xf32>
    %37 = math.exp %36 : vector<16x512xf32>
    %38 = arith.mulf %33, %37 : vector<16x512xf32>
    %cst_17 = arith.constant 1.000000e+00 : f32
    %39 = vector.broadcast %cst_17 : f32 to vector<16x512xf32>
    %40 = arith.subf %39, %38 : vector<16x512xf32>
    %cst_18 = arith.constant 0.000000e+00 : f32
    %41 = vector.broadcast %cst_18 : f32 to vector<16x512xf32>
    %42 = arith.cmpf olt, %12, %41 : vector<16x512xf32>
    %cst_19 = arith.constant 0.000000e+00 : f32
    %43 = vector.broadcast %cst_19 : f32 to vector<16x512xf32>
    %44 = arith.subf %43, %40 : vector<16x512xf32>
    %45 = arith.select %42, %44, %40 : vector<16x512xi1>, vector<16x512xf32>
    %cst_20 = arith.constant 1.000000e+00 : f32
    %46 = vector.broadcast %cst_20 : f32 to vector<16x512xf32>
    %47 = arith.addf %46, %45 : vector<16x512xf32>
    %48 = arith.mulf %10, %47 : vector<16x512xf32>
    %c0_21 = arith.constant 0 : index
    %c0_22 = arith.constant 0 : index
    %49 = vector.load %arg12[%c0_21, %c0_22] : memref<16x128xf32, #tpu.memory_space<vmem>>, vector<16x128xf32>
    %50 = arith.truncf %48 : vector<16x512xf32> to vector<16x512xbf16>
    %c0_23 = arith.constant 0 : index
    %c0_24 = arith.constant 0 : index
    %51 = vector.load %arg8[%c0_23, %c0_24] : memref<512x128xbf16, #tpu.memory_space<vmem>>, vector<512x128xbf16>
    %cst_25 = arith.constant dense<0.000000e+00> : vector<16x128xf32>
    %52 = tpu.matmul %50, %51, %cst_25 {dimension_numbers = #tpu.dot_dimension_numbers<[1], [0], [0], [1], [0, 0, 1, 1], [], []>} : vector<16x512xbf16>, vector<512x128xbf16>, vector<16x128xf32> -> vector<16x128xf32>
    %53 = arith.addf %49, %52 : vector<16x128xf32>
    %c0_26 = arith.constant 0 : index
    %c0_27 = arith.constant 0 : index
    %54 = vector.load %arg12[%c0_26, %c0_27] : memref<16x128xf32, #tpu.memory_space<vmem>>, vector<16x128xf32>
    tpu.vector_store %arg12[%c0_26, %c0_27], %53 {strides = array<i32>} : memref<16x128xf32, #tpu.memory_space<vmem>>, vector<16x128xf32>,
    %c0_i32_28 = arith.constant 0 : i32
    %55 = arith.cmpi eq, %arg2, %c0_i32_28 : i32
    %56 = arith.extui %55 : i1 to i32
    %c0_i32_29 = arith.constant 0 : i32
    %57 = arith.cmpi ne, %56, %c0_i32_29 : i32
    scf.if %57 {
      %c0_30 = arith.constant 0 : index
      %c0_31 = arith.constant 0 : index
      %58 = vector.load %arg12[%c0_30, %c0_31] : memref<16x128xf32, #tpu.memory_space<vmem>>, vector<16x128xf32>
      %59 = arith.truncf %58 : vector<16x128xf32> to vector<16x128xbf16>
      %c0_32 = arith.constant 0 : index
      %c0_33 = arith.constant 0 : index
      %c0_34 = arith.constant 0 : index
      %60 = vector.load %arg10[%c0_32, %c0_33, %c0_34] : memref<1x16x128xbf16, #tpu.memory_space<vmem>>, vector<1x16x128xbf16>
      %61 = vector.shape_cast %60 : vector<1x16x128xbf16> to vector<16x128xbf16>
      %62 = vector.shape_cast %59 : vector<16x128xbf16> to vector<1x16x128xbf16>
      tpu.vector_store %arg10[%c0_32, %c0_33, %c0_34], %62 {strides = array<i32>} : memref<1x16x128xbf16, #tpu.memory_space<vmem>>, vector<1x16x128xbf16>,
    } else {
    }
    return
  }
  func.func @transform_0(%arg0: i32, %arg1: i32, %arg2: i32) -> (i32, i32, i32) {
    %c0_i32 = arith.constant 0 : i32
    %c0_i32_0 = arith.constant 0 : i32
    return %arg0, %arg1, %c0_i32 : i32, i32, i32
  }
  func.func @transform_1(%arg0: i32, %arg1: i32, %arg2: i32) -> (i32, i32) {
    %c0_i32 = arith.constant 0 : i32
    %c0_i32_0 = arith.constant 0 : i32
    %c0_i32_1 = arith.constant 0 : i32
    return %c0_i32, %c0_i32_0 : i32, i32
  }
  func.func @transform_2(%arg0: i32, %arg1: i32, %arg2: i32) -> (i32, i32) {
    %c0_i32 = arith.constant 0 : i32
    %c0_i32_0 = arith.constant 0 : i32
    %c0_i32_1 = arith.constant 0 : i32
    return %c0_i32, %c0_i32_0 : i32, i32
  }
  func.func @transform_3(%arg0: i32, %arg1: i32, %arg2: i32) -> (i32, i32) {
    %c0_i32 = arith.constant 0 : i32
    %c0_i32_0 = arith.constant 0 : i32
    return %c0_i32, %arg2 : i32, i32
  }
  func.func @transform_4(%arg0: i32, %arg1: i32, %arg2: i32) -> (i32, i32) {
    %c0_i32 = arith.constant 0 : i32
    %c0_i32_0 = arith.constant 0 : i32
    return %c0_i32, %arg2 : i32, i32
  }
  func.func @transform_5(%arg0: i32, %arg1: i32, %arg2: i32) -> (i32, i32) {
    %c0_i32 = arith.constant 0 : i32
    %c0_i32_0 = arith.constant 0 : i32
    return %arg2, %c0_i32 : i32, i32
  }
  func.func @transform_6(%arg0: i32, %arg1: i32, %arg2: i32) -> (i32, i32) {
    %c0_i32 = arith.constant 0 : i32
    %c0_i32_0 = arith.constant 0 : i32
    %c0_i32_1 = arith.constant 0 : i32
    return %c0_i32, %c0_i32_0 : i32, i32
  }
  func.func @transform_7(%arg0: i32, %arg1: i32, %arg2: i32) -> (i32, i32, i32) {
    %c0_i32 = arith.constant 0 : i32
    %c0_i32_0 = arith.constant 0 : i32
    return %arg0, %arg1, %c0_i32 : i32, i32, i32
  }
}

module attributes {stable_mosaic.version = 11 : i64} {
  func.func @_ln_meanpool_kernel(%arg0: i32, %arg1: memref<1x16x128xbf16, #tpu.memory_space<vmem>>, %arg2: memref<1x128xf32, #tpu.memory_space<vmem>>, %arg3: memref<1x128xf32, #tpu.memory_space<vmem>>, %arg4: memref<1x1x128xf32, #tpu.memory_space<vmem>>) attributes {dimension_semantics = [#tpu.dimension_semantics<parallel>], iteration_bounds = array<i64: 2>, scalar_prefetch = 0 : i64, scratch_operands = 0 : i64, tpu.core_type = #tpu.core_type<tc>, window_params = [{transform_indices = @transform_0, window_bounds = array<i64: 1, 16, 128>}, {pipeline_mode = #tpu.pipeline_mode<synchronous>, transform_indices = @transform_1, window_bounds = array<i64: 1, 128>}, {pipeline_mode = #tpu.pipeline_mode<synchronous>, transform_indices = @transform_2, window_bounds = array<i64: 1, 128>}, {transform_indices = @transform_3, window_bounds = array<i64: 1, 1, 128>}]} {
    %c0 = arith.constant 0 : index
    %c0_0 = arith.constant 0 : index
    %c0_1 = arith.constant 0 : index
    %0 = vector.load %arg1[%c0, %c0_0, %c0_1] : memref<1x16x128xbf16, #tpu.memory_space<vmem>>, vector<1x16x128xbf16>
    %1 = vector.shape_cast %0 : vector<1x16x128xbf16> to vector<16x128xbf16>
    %2 = arith.extf %1 : vector<16x128xbf16> to vector<16x128xf32>
    %c0_2 = arith.constant 0 : index
    %c0_3 = arith.constant 0 : index
    %3 = vector.load %arg2[%c0_2, %c0_3] : memref<1x128xf32, #tpu.memory_space<vmem>>, vector<1x128xf32>
    %c0_4 = arith.constant 0 : index
    %c0_5 = arith.constant 0 : index
    %4 = vector.load %arg3[%c0_4, %c0_5] : memref<1x128xf32, #tpu.memory_space<vmem>>, vector<1x128xf32>
    %cst = arith.constant dense<0.000000e+00> : vector<16xf32>
    %5 = vector.multi_reduction <add>, %2, %cst [1] : vector<16x128xf32> to vector<16xf32>
    %6 = vector.shape_cast %5 : vector<16xf32> to vector<16x1xf32>
    %cst_6 = arith.constant 1.280000e+02 : f32
    %7 = vector.broadcast %cst_6 : f32 to vector<16x1xf32>
    %8 = arith.divf %6, %7 : vector<16x1xf32>
    %9 = vector.broadcast %8 : vector<16x1xf32> to vector<16x128xf32>
    %10 = arith.subf %2, %9 : vector<16x128xf32>
    %11 = arith.mulf %10, %10 : vector<16x128xf32>
    %cst_7 = arith.constant dense<0.000000e+00> : vector<16xf32>
    %12 = vector.multi_reduction <add>, %11, %cst_7 [1] : vector<16x128xf32> to vector<16xf32>
    %13 = vector.shape_cast %12 : vector<16xf32> to vector<16x1xf32>
    %cst_8 = arith.constant 1.280000e+02 : f32
    %14 = vector.broadcast %cst_8 : f32 to vector<16x1xf32>
    %15 = arith.divf %13, %14 : vector<16x1xf32>
    %cst_9 = arith.constant 9.99999974E-6 : f32
    %16 = vector.broadcast %cst_9 : f32 to vector<16x1xf32>
    %17 = arith.addf %15, %16 : vector<16x1xf32>
    %18 = math.rsqrt %17 : vector<16x1xf32>
    %19 = vector.broadcast %18 : vector<16x1xf32> to vector<16x128xf32>
    %20 = arith.mulf %10, %19 : vector<16x128xf32>
    %21 = vector.broadcast %3 : vector<1x128xf32> to vector<16x128xf32>
    %22 = arith.mulf %20, %21 : vector<16x128xf32>
    %23 = vector.broadcast %4 : vector<1x128xf32> to vector<16x128xf32>
    %24 = arith.addf %22, %23 : vector<16x128xf32>
    %cst_10 = arith.constant dense<0.000000e+00> : vector<128xf32>
    %25 = vector.multi_reduction <add>, %24, %cst_10 [0] : vector<16x128xf32> to vector<128xf32>
    %26 = vector.shape_cast %25 : vector<128xf32> to vector<1x128xf32>
    %cst_11 = arith.constant 1.600000e+01 : f32
    %27 = vector.broadcast %cst_11 : f32 to vector<1x128xf32>
    %28 = arith.divf %26, %27 : vector<1x128xf32>
    %c0_12 = arith.constant 0 : index
    %c0_13 = arith.constant 0 : index
    %c0_14 = arith.constant 0 : index
    %29 = vector.load %arg4[%c0_12, %c0_13, %c0_14] : memref<1x1x128xf32, #tpu.memory_space<vmem>>, vector<1x1x128xf32>
    %30 = vector.shape_cast %29 : vector<1x1x128xf32> to vector<1x128xf32>
    %31 = vector.shape_cast %28 : vector<1x128xf32> to vector<1x1x128xf32>
    tpu.vector_store %arg4[%c0_12, %c0_13, %c0_14], %31 {strides = array<i32>} : memref<1x1x128xf32, #tpu.memory_space<vmem>>, vector<1x1x128xf32>,
    return
  }
  func.func @transform_0(%arg0: i32) -> (i32, i32, i32) {
    %c0_i32 = arith.constant 0 : i32
    %c0_i32_0 = arith.constant 0 : i32
    %c0_i32_1 = arith.constant 0 : i32
    return %arg0, %c0_i32, %c0_i32_0 : i32, i32, i32
  }
  func.func @transform_1(%arg0: i32) -> (i32, i32) {
    %c0_i32 = arith.constant 0 : i32
    %c0_i32_0 = arith.constant 0 : i32
    %c0_i32_1 = arith.constant 0 : i32
    return %c0_i32, %c0_i32_0 : i32, i32
  }
  func.func @transform_2(%arg0: i32) -> (i32, i32) {
    %c0_i32 = arith.constant 0 : i32
    %c0_i32_0 = arith.constant 0 : i32
    %c0_i32_1 = arith.constant 0 : i32
    return %c0_i32, %c0_i32_0 : i32, i32
  }
  func.func @transform_3(%arg0: i32) -> (i32, i32, i32) {
    %c0_i32 = arith.constant 0 : i32
    %c0_i32_0 = arith.constant 0 : i32
    %c0_i32_1 = arith.constant 0 : i32
    return %arg0, %c0_i32, %c0_i32_0 : i32, i32, i32
  }
}

</mosaic_0001>

<bundles_post_ra>
// kernel: vit_backbone_forward.6
= control target key start
LH: loop header
LB: loop body
LE: loop exit
PB: predicated region body
PF: predicated region fallthrough
CT: control target
= control target key end

     0   :  { %s1205_s15 = smov 0   ;;  %s1207_s16 = smov 0   ;;  %s1407_s0 = inlined_call_operand.vmem [shape: bf16[2,16,768], index: 0, kind: input, shape index: {}]   ;;  %s1408_s1 = inlined_call_operand.vmem [shape: bf16[768,128], index: 1, kind: input, shape index: {}]   ;;  %s1409_s2 = inlined_call_operand.vmem [shape: f32[1,128], index: 2, kind: input, shape index: {}]   ;;  %s1410_s3 = inlined_call_operand.vmem [shape: f32[1,16,128], index: 3, kind: input, shape index: {}]   ;;  %s1411_s4 = inlined_call_operand.vmem [shape: bf16[2,16,128], index: 4, kind: output, shape index: {}]  }
   0x1   :  { %s1209_s17 = smov 0  }
   0x2 LB: > { %s26_s18 = sadd.s32 1, %s1174_s16  ;;  %p937_p0 = scmp.ge.s32.totalorder %s1178_s17, 1  ;;  %s1178_s17 = sphi %s1209_s17, %s14_s17   ;;  %s1174_s16 = sphi %s1207_s16, %s1413_s16   ;;  %s1170_s15 = sphi %s1205_s15, %s1412_s15  }
   0x3   : > { %p28_p1 = scmp.ge.s32.totalorder %s26_s18, 2  ;;  %p195_p2 = scmp.lt.s32.totalorder %s1178_s17, 3 }
   0x5   : > { %s1415_s18 = smov (%p28_p1, %s26_s18), 0  ;;  %p196_p3 = pnand %p937_p0, %p195_p2 }
   0x6   : > { %p236_p4 = scmp.lt.s32.totalorder (!%p196_p3), %s1170_s15, 1 }
   0x7   : > { %199 = sbr.rel (%p196_p3) target bundleno = 285 (0x11d), region = 36 }
   0xc   : > { %v1099_v0 = vld [vmem:[%s1408_s1 + $0x78] sm:$0xff]   ;;  %v1103_v4 = vld [vmem:[%s1408_s1 + $0x70] sm:$0xff]   ;;  %v1107_v8 = vld [vmem:[%s1408_s1 + $0x68] sm:$0xff]   ;;  %s1417_s15 = smov (!%p236_p4, %s1170_s15), 1 }
   0xd   : > { %v1100_v1 = vld [vmem:[%s1408_s1 + $0x38] sm:$0xff]   ;;  %1008 = vmatprep.subr.bf16.mxu0 %v1099_v0  ;;  %v1104_v5 = vld [vmem:[%s1408_s1 + $0x30] sm:$0xff]   ;;  %v1108_v9 = vld [vmem:[%s1408_s1 + $0x28] sm:$0xff]   ;;  %s1074_s25 = smul.u32 48, %s1417_s15  ;;  %s1000_s12 = sshll.u32 %s1417_s15, 3 }
   0xe   : > { %v1101_v2 = vld [vmem:[%s1408_s1 + $0xf8] sm:$0xff]   ;;  %1009 = vmatpush3.bf16.msra.mxu0 %v1100_v1  ;;  %v1105_v6 = vld [vmem:[%s1408_s1 + $0xf0] sm:$0xff]   ;;  %v1109_v10 = vld [vmem:[%s1408_s1 + $0xe8] sm:$0xff]   ;;  %s260_s19 = scalar_lea.vmem %s1411_s4, %s1000_s12 }
   0xf   : > { %v1102_v3 = vld [vmem:[%s1408_s1 + $0xb8] sm:$0xff]   ;;  %1030 = vmatprep.subr.bf16.mxu1 %v1101_v2  ;;  %1010 = vmatprep.subr.bf16.mxu0 %v1103_v4  ;;  %v1106_v7 = vld [vmem:[%s1408_s1 + $0xb0] sm:$0xff]   ;;  %v1110_v11 = vld [vmem:[%s1408_s1 + $0xa8] sm:$0xff]   ;;  %s1320_s10 = scalar_lea.vmem %s1407_s0, %s1074_s25 }
  0x10   : > { %1031 = vmatpush3.bf16.msra.mxu1 %v1102_v3  ;;  %v1111_v12 = vld [vmem:[%s1408_s1 + $0x60] sm:$0xff]   ;;  %v1115_v16 = vld [vmem:[%s1408_s1 + $0x58] sm:$0xff]   ;;  %v1119_v20 = vld [vmem:[%s1408_s1 + $0x50] sm:$0xff]  }
  0x11   : > { %1032 = vmatprep.subr.bf16.mxu1 %v1105_v6  ;;  %v1112_v13 = vld [vmem:[%s1408_s1 + $0x20] sm:$0xff]   ;;  %v1116_v17 = vld [vmem:[%s1408_s1 + $0x18] sm:$0xff]   ;;  %v1120_v21 = vld [vmem:[%s1408_s1 + $0x10] sm:$0xff]  }
  0x12   : > { %1011 = vmatpush3.bf16.msra.mxu0 %v1104_v5  ;;  %v1113_v14 = vld [vmem:[%s1408_s1 + $0xe0] sm:$0xff]   ;;  %v1117_v18 = vld [vmem:[%s1408_s1 + $0xd8] sm:$0xff]   ;;  %v1121_v22 = vld [vmem:[%s1408_s1 + $0xd0] sm:$0xff]  }
  0x13   : > { %1012 = vmatprep.subr.bf16.mxu0 %v1107_v8  ;;  %v1114_v15 = vld [vmem:[%s1408_s1 + $0xa0] sm:$0xff]   ;;  %v1118_v19 = vld [vmem:[%s1408_s1 + $0x98] sm:$0xff]   ;;  %v1122_v23 = vld [vmem:[%s1408_s1 + $0x90] sm:$0xff]  }
  0x14   : > { %1033 = vmatpush3.bf16.msra.mxu1 %v1106_v7  ;;  %v1123_v24 = vld [vmem:[%s1408_s1 + $0x48] sm:$0xff]   ;;  %v1127_v28 = vld [vmem:[%s1408_s1 + $0x40] sm:$0xff]   ;;  %v1134_v34 = vld [vmem:[%s1408_s1 + $0x178] sm:$0xff]  }
  0x15   : > { %1034 = vmatprep.subr.bf16.mxu1 %v1109_v10  ;;  %v1124_v25 = vld [vmem:[%s1408_s1 + $0x8] sm:$0xff]   ;;  %v1128_v29 = vld [vmem:[%s1408_s1] sm:$0xff]   ;;  %v1138_v37 = vld [vmem:[%s1408_s1 + $0x138] sm:$0xff]  }
  0x16   : > { %1013 = vmatpush3.bf16.msra.mxu0 %v1108_v9  ;;  %v1125_v26 = vld [vmem:[%s1408_s1 + $0xc8] sm:$0xff]   ;;  %v1129_v30 = vld [vmem:[%s1408_s1 + $0xc0] sm:$0xff]   ;;  %v1139_v38 = vld [vmem:[%s1408_s1 + $0x170] sm:$0xff]  }
  0x17   : > { %1014 = vmatprep.subr.bf16.mxu0 %v1111_v12  ;;  %v1126_v27 = vld [vmem:[%s1408_s1 + $0x88] sm:$0xff]   ;;  %v1130_v31 = vld [vmem:[%s1320_s10] ss:$24 sps:$4 sm:$0xff]   ;;  %v1132_v32 = vld [vmem:[%s1320_s10 + $0x4] ss:$24 sps:$4 sm:$0xff]  }
  0x18   : > { %1035 = vmatpush3.bf16.msra.mxu1 %v1110_v11  ;;  %v1133_v33 = vld [vmem:[%s1408_s1 + $0x80] sm:$0xff]   ;;  %722 = vmatprep.mubr.bf16.mxu0 %v1132_v32  ;;  %v1140_v39 = vld [vmem:[%s1408_s1 + $0x130] sm:$0xff]   ;;  %v1141_v40 = vld [vmem:[%s1408_s1 + $0x168] sm:$0xff]  }
  0x19   : > { %1036 = vmatprep.subr.bf16.mxu1 %v1113_v14  ;;  %v1135_v35 = vld [vmem:[%s1320_s10 + $0x8] ss:$24 sps:$4 sm:$0xff]   ;;  %v1137_v36 = vld [vmem:[%s1320_s10 + $0xc] ss:$24 sps:$4 sm:$0xff]   ;;  %v1145_v44 = vld [vmem:[%s1408_s1 + $0x158] sm:$0xff]  }
  0x1a   : > { %1015 = vmatpush3.bf16.msra.mxu0 %v1112_v13  ;;  %763 = vmatprep.mubr.bf16.mxu1 %v1137_v36  ;;  %v1142_v41 = vld [vmem:[%s1408_s1 + $0x128] sm:$0xff]   ;;  %v1143_v42 = vld [vmem:[%s1408_s1 + $0x160] sm:$0xff]   ;;  %v1146_v45 = vld [vmem:[%s1408_s1 + $0x118] sm:$0xff]  }
  0x1b   : > { %1016 = vmatprep.subr.bf16.mxu0 %v1115_v16  ;;  %v1144_v43 = vld [vmem:[%s1408_s1 + $0x120] sm:$0xff]   ;;  %v1147_v46 = vld [vmem:[%s1408_s1 + $0x150] sm:$0xff]   ;;  %v1149_v49 = vld [vmem:[%s1408_s1 + $0x148] sm:$0xff]  }
  0x1c   : > { %1037 = vmatpush3.bf16.msra.mxu1 %v1114_v15  ;;  %v1155_v47 = vld [vmem:[%s1320_s10 + $0x14] ss:$24 sps:$4 sm:$0xff]   ;;  %v1151_v51 = vld [vmem:[%s1408_s1 + $0x140] sm:$0xff]   ;;  %v1153_v53 = vld [vmem:[%s1320_s10 + $0x10] ss:$24 sps:$4 sm:$0xff]  }
  0x1d   : > { %1038 = vmatprep.subr.bf16.mxu1 %v1117_v18  ;;  %v1148_v48 = vld [vmem:[%s1408_s1 + $0x110] sm:$0xff]   ;;  %v1150_v50 = vld [vmem:[%s1408_s1 + $0x108] sm:$0xff]   ;;  %v1152_v52 = vld [vmem:[%s1408_s1 + $0x100] sm:$0xff]  }
  0x1e   : > { %1017 = vmatpush3.bf16.msra.mxu0 %v1116_v17  ;;  %v941_v62 = vld [vmem:[%s1409_s2] ss:$0 sm:$0xff]  ;;  %v814_v15 = vld [vmem:[%s1410_s3 + $0x8] sm:$0xff] }
  0x1f   : > { %1018 = vmatprep.subr.bf16.mxu0 %v1119_v20  ;;  %v813_v14 = vld [vmem:[%s1410_s3] sm:$0xff] }
  0x20   : > { %1039 = vmatpush3.bf16.msra.mxu1 %v1118_v19 }
  0x21   : > { %1040 = vmatprep.subr.bf16.mxu1 %v1121_v22 }
  0x22   : > { %1019 = vmatpush3.bf16.msra.mxu0 %v1120_v21 }
  0x23   : > { %1020 = vmatprep.subr.bf16.mxu0 %v1123_v24 }
  0x24   : > { %1041 = vmatpush3.bf16.msra.mxu1 %v1122_v23 }
  0x25   : > { %1042 = vmatprep.subr.bf16.mxu1 %v1125_v26 }
  0x26   : > { %1021 = vmatpush3.bf16.msra.mxu0 %v1124_v25 }
  0x27   : > { %1022 = vmatprep.subr.bf16.mxu0 %v1127_v28 }
  0x28   : > { %1043 = vmatpush3.bf16.msra.mxu1 %v1126_v27 }
  0x29   : > { %1044 = vmatprep.subr.bf16.mxu1 %v1129_v30 }
  0x2a   : > { %1023 = vmatpush3.bf16.msra.mxu0 %v1128_v29 }
  0x2b   : > { %1052 = vmatprep.subr.bf16.mxu0 %v1134_v34 }
  0x2c   : > { %1045 = vmatpush3.bf16.msra.mxu1 %v1133_v33 }
  0x2d   : > { %723 = vmatmul.mubr.bf16.vlgmr.msra.gmra.mxu0 %v1130_v31 }
  0x2e   : > { %1053 = vmatpush3.bf16.msra.mxu0 %v1138_v37  ;;  %804 = vmatprep.mubr.bf16.mxu0 %v1155_v47 }
  0x2f   : > { %764 = vmatmul.mubr.bf16.vlgmr.msra.gmra.mxu1 %v1135_v35  ;;  %1054 = vmatprep.subr.bf16.mxu0 %v1139_v38 }
  0x32   : > { %1055 = vmatpush3.bf16.msra.mxu0 %v1140_v39 }
  0x33   : > { %1056 = vmatprep.subr.bf16.mxu0 %v1141_v40 }
  0x36   : > { %1057 = vmatpush3.bf16.msra.mxu0 %v1142_v41 }
  0x37   : > { %1058 = vmatprep.subr.bf16.mxu0 %v1143_v42 }
  0x3a   : > { %1059 = vmatpush3.bf16.msra.mxu0 %v1144_v43 }
  0x3b   : > { %1060 = vmatprep.subr.bf16.mxu0 %v1145_v44 }
  0x3e   : > { %1061 = vmatpush3.bf16.msra.mxu0 %v1146_v45 }
  0x3f   : > { %1062 = vmatprep.subr.bf16.mxu0 %v1147_v46 }
  0x42   : > { %1063 = vmatpush3.bf16.msra.mxu0 %v1148_v48 }
  0x43   : > { %1064 = vmatprep.subr.bf16.mxu0 %v1149_v49 }
  0x46   : > { %1065 = vmatpush3.bf16.msra.mxu0 %v1150_v50 }
  0x47   : > { %1066 = vmatprep.subr.bf16.mxu0 %v1151_v51 }
  0x4a   : > { %1067 = vmatpush3.bf16.msra.mxu0 %v1152_v52 }
  0x4d   : > { %805 = vmatmul.mubr.bf16.vlgmr.msra.gmra.mxu0 %v1153_v53 }
  0xed   : > { %v1024_v54 = vpop.f32.mrf.mxu0 }
  0xef   : > { %v1025_v55 = vpop.f32.mrf.mxu0  ;;  %v1046_v56 = vpop.f32.mrf.mxu1 }
  0xf0   : > { %v1026_v61 = vadd.f32 %v1025_v55, %v1024_v54 }
  0xf1   : > { %v1027_v57 = vpop.f32.mrf.mxu0  ;;  %v1047_v58 = vpop.f32.mrf.mxu1 }
  0xf2   : > { %v725_v2 = vadd.f32 %v1026_v61, %v941_v62  ;;  %v1048_v3 = vadd.f32 %v1047_v58, %v1046_v56 }
  0xf3   : > { %v1028_v59 = vpop.f32.mrf.mxu0  ;;  %v1049_v60 = vpop.f32.mrf.mxu1 }
  0xf4   : > { %v1029_v63 = vadd.f32 %v1028_v59, %v1027_v57  ;;  %v766_v9 = vadd.f32 %v1048_v3, %v725_v2 }
  0xf5   : > { %v1050_v0 = vpop.f32.mrf.mxu1 }
  0xf6   : > { %v728_v5 = vadd.f32 %v1029_v63, %v941_v62  ;;  %v1051_v6 = vadd.f32 %v1050_v0, %v1049_v60 }
  0xf8   : > { %v769_v11 = vadd.f32 %v1051_v6, %v728_v5 }
 0x10d   : > { %v1068_v1 = vpop.f32.mrf.mxu0 }
 0x10f   : > { %v1069_v4 = vpop.f32.mrf.mxu0 }
 0x110   : > { %v1070_v7 = vadd.f32 %v1069_v4, %v1068_v1 }
 0x111   : > { %v1071_v8 = vpop.f32.mrf.mxu0 }
 0x112   : > { %v807_v12 = vadd.f32 %v1070_v7, %v766_v9 }
 0x113   : > { %v1072_v10 = vpop.f32.mrf.mxu0 }
 0x114   : > { %v1073_v13 = vadd.f32 %v1072_v10, %v1071_v8  ;;  %v815_v17 = vadd.f32 %v813_v14, %v807_v12 }
 0x116   : > { %v810_v16 = vadd.f32 %v1073_v13, %v769_v11 }
 0x118   : > { %v816_v18 = vadd.f32 %v814_v15, %v810_v16 }
 0x11a   : > { %v1006_v19 = vpack.c.bf16 %v816_v18, %v815_v17 }
 0x11c   : > { %1007 = vst [vmem:[%s260_s19] sm:$0xff] %v1006_v19  }
 0x11d PF: > { %s14_s17 = sadd.s32 1, %s1178_s17   ;;  %s1412_s15 = smov %s1174_s16 }
 0x11e   : > { %p11_p5 = scmp.ge.s32.totalorder %s14_s17, 4   ;;  %s1413_s16 = smov %s1415_s18 }
 0x120   :  { %13 = sbr.rel (!%p11_p5) target bundleno = 2 (0x2), region = 69 }

// kernel: vit_backbone_forward.7
= control target key start
LH: loop header
LB: loop body
LE: loop exit
PB: predicated region body
PF: predicated region fallthrough
CT: control target
= control target key end

     0   :  { %s1619_s24 = smov 0   ;;  %s1871_s0 = inlined_call_operand.vmem [shape: bf16[2,16,128], index: 0, kind: input, shape index: {}]   ;;  %s1872_s1 = inlined_call_operand.vmem [shape: f32[1,128], index: 1, kind: input, shape index: {}]   ;;  %s1873_s2 = inlined_call_operand.vmem [shape: f32[1,128], index: 2, kind: input, shape index: {}]   ;;  %s1874_s3 = inlined_call_operand.vmem [shape: bf16[128,384], index: 3, kind: input, shape index: {}]   ;;  %s1875_s4 = inlined_call_operand.vmem [shape: f32[1,384], index: 4, kind: input, shape index: {}]   ;;  %s1876_s5 = inlined_call_operand.vmem [shape: bf16[128,128], index: 5, kind: input, shape index: {}]   ;;  %s1877_s6 = inlined_call_operand.vmem [shape: f32[1,128], index: 6, kind: input, shape index: {}]   ;;  %s1878_s7 = inlined_call_operand.vmem [shape: bf16[2,16,128], index: 7, kind: output, shape index: {}]  }
   0x1 LB: > { %s1284_s25 = sadd.s32 4294967295, %s1571_s24   ;;  %p1288_p0 = scmp.ge.s32.totalorder %s1571_s24, 1  ;;  %s1571_s24 = sphi %s1619_s24, %s17_s24  }
   0x2   : > { %p237_p1 = scmp.lt.s32.totalorder %s1571_s24, 3 }
   0x4   : > { %p238_p2 = pnand %p1288_p0, %p237_p1 }
   0x5   : > { %p269_p3 = scmp.lt.s32.totalorder (!%p238_p2), %s1284_s25, 1  ;;  %s1576_s21 = smov (!%p238_p2), 96  }
   0x6   : > { %241 = sbr.rel (%p238_p2) target bundleno = 2120 (0x848), region = 48  ;;  %s1577_s22 = smov (!%p238_p2), 64  }
   0x7   : > { %s1578_s23 = smov (!%p238_p2), 32  }
   0xb   : > { %s1880_s25 = smov (!%p269_p3, %s1284_s25), 1  ;;  %v1489_v3 = vld [vmem:[%s1874_s3 + $0xac] ss:$12 sps:$4 sm:$0xff]   ;;  %v1491_v4 = vld [vmem:[%s1874_s3 + $0xa8] ss:$12 sps:$4 sm:$0xff]   ;;  %v1573_v5 = vmov 0.0   ;;  %v360_v54 = vlaneseq }
   0xc   : > { %s1340_s26 = sshll.u32 %s1880_s25, 3  ;;  %1387 = vmatprep.subr.bf16.mxu1 %v1573_v5  ;;  %v1492_v6 = vld [vmem:[%s1874_s3 + $0xb0] ss:$12 sps:$4 sm:$0xff]   ;;  %503 = vmatprep.subr.bf16.mxu0 %v1489_v3  ;;  %v1493_v15 = vld [vmem:[%s1874_s3 + $0x94] ss:$12 sps:$4 sm:$0xff]   ;;  %v1574_v28 = vmov 0  }
   0xd   : > { %s273_s29 = scalar_lea.vmem %s1871_s0, %s1340_s26  ;;  %504 = vmatpush1.bf16.msra.mxu0 %v1491_v4  ;;  %1388 = vmatpush3.bf16.msra.mxu1 %v1492_v6  ;;  %v1495_v16 = vld [vmem:[%s1874_s3 + $0x90] ss:$12 sps:$4 sm:$0xff]   ;;  %v1496_v17 = vld [vmem:[%s1874_s3 + $0x98] ss:$12 sps:$4 sm:$0xff]   ;;  %v1500_v20 = vld [vmem:[%s1874_s3 + $0x80] ss:$12 sps:$4 sm:$0xff]   ;;  %s278_s27 = scalar_lea.vmem %s1878_s7, %s1340_s26 }
   0xe   : > { %v1345_v0 = vld [vmem:[%s273_s29] sm:$0xff]   ;;  %1389 = vmatprep.subr.bf16.mxu1 %v1573_v5  ;;  %505 = vmatprep.subr.bf16.mxu0 %v1493_v15  ;;  %v1497_v18 = vld [vmem:[%s1874_s3 + $0x7c] ss:$12 sps:$4 sm:$0xff]   ;;  %v1505_v24 = vld [vmem:[%s1874_s3 + $0x4c] ss:$12 sps:$4 sm:$0xff]   ;;  %vm1575_vm0 = vmmov 0  }
   0xf   : > { %v1635_v1 = vunpack.c.l.bf16 %v1345_v0  ;;  %v1638_v2 = vunpack.c.h.bf16 %v1345_v0  ;;  %v1499_v19 = vld [vmem:[%s1874_s3 + $0x78] ss:$12 sps:$4 sm:$0xff]   ;;  %v1503_v22 = vld [vmem:[%s1874_s3 + $0x60] ss:$12 sps:$4 sm:$0xff]   ;;  %v1504_v23 = vld [vmem:[%s1874_s3 + $0x68] ss:$12 sps:$4 sm:$0xff]   ;;  %535 = vmatprep.mubr.bf16.mxu0 %v1574_v28  ;;  %1403 = vmatprep.mubr.msk.bf16.mxu1 %vm1575_vm0, %v1573_v5 }
  0x10   : > { %v1501_v21 = vld [vmem:[%s1874_s3 + $0x64] ss:$12 sps:$4 sm:$0xff]   ;;  %v1507_v25 = vld [vmem:[%s1874_s3 + $0x48] ss:$12 sps:$4 sm:$0xff]   ;;  %v1516_v33 = vld [vmem:[%s1874_s3 + $0x20] ss:$12 sps:$4 sm:$0xff]  }
  0x11   : > { %286 = vadd.xlane.f32.xlu0 %v1635_v1  ;;  %506 = vmatpush1.bf16.msra.mxu0 %v1495_v16  ;;  %v1508_v26 = vld [vmem:[%s1874_s3 + $0x50] ss:$12 sps:$4 sm:$0xff]   ;;  %v1509_v27 = vld [vmem:[%s1874_s3 + $0x34] ss:$12 sps:$4 sm:$0xff]   ;;  %v1512_v30 = vld [vmem:[%s1874_s3 + $0x38] ss:$12 sps:$4 sm:$0xff]  }
  0x12   : > { %1390 = vmatpush3.bf16.msra.mxu1 %v1496_v17  ;;  %507 = vmatprep.subr.bf16.mxu0 %v1497_v18  ;;  %v1511_v29 = vld [vmem:[%s1874_s3 + $0x30] ss:$12 sps:$4 sm:$0xff]   ;;  %v1515_v32 = vld [vmem:[%s1874_s3 + $0x18] ss:$12 sps:$4 sm:$0xff]   ;;  %v1519_v35 = vld [vmem:[%s1874_s3] ss:$12 sps:$4 sm:$0xff]  }
  0x13   : > { %1391 = vmatprep.subr.bf16.mxu1 %v1573_v5  ;;  %v1513_v31 = vld [vmem:[%s1874_s3 + $0x1c] ss:$12 sps:$4 sm:$0xff]   ;;  %v1517_v34 = vld [vmem:[%s1874_s3 + $0x4] ss:$12 sps:$4 sm:$0xff]   ;;  %v1293_v45 = vld [vmem:[%s1872_s1] ss:$0 sm:$0xff] }
  0x14   : > { %v1520_v36 = vld [vmem:[%s1874_s3 + $0x8] ss:$12 sps:$4 sm:$0xff]   ;;  %v1294_v49 = vld [vmem:[%s1873_s2] ss:$0 sm:$0xff]  ;;  %v361_v55 = vshrl.u32 %v360_v54, 7  ;;  %vm590_vm1 = vcmask 261120  }
  0x15   : > { %288 = vadd.xlane.f32.xlu0 %v1638_v2  ;;  %508 = vmatpush1.bf16.msra.mxu0 %v1499_v19  ;;  %v358_v59 = vld [vmem:[%s1875_s4] sm:$0x7]  ;;  %vm640_vm2 = vcmask 130048   ;;  %vm1096_vm3 = vcmask 523264   ;;  %vm1099_vm4 = vcmask 785408  }
  0x16   : > { %1392 = vmatpush3.bf16.msra.mxu1 %v1500_v20  ;;  %509 = vmatprep.subr.bf16.mxu0 %v1501_v21  ;;  %v366_v56 = vsub.s32 1, %v361_v55  ;;  %v362_v6 = vsub.s32 0, %v361_v55 }
  0x17   : > { %1393 = vmatprep.subr.bf16.mxu1 %v1573_v5 }
  0x18   : > { %v367_v62 = vrot.slane %v358_v59, %v366_v56 }
  0x19   : > { %510 = vmatpush1.bf16.msra.mxu0 %v1503_v22 }
  0x1a   : > { %1394 = vmatpush3.bf16.msra.mxu1 %v1504_v23  ;;  %511 = vmatprep.subr.bf16.mxu0 %v1505_v24 }
  0x1b   : > { %1395 = vmatprep.subr.bf16.mxu1 %v1573_v5 }
  0x1d   : > { %512 = vmatpush1.bf16.msra.mxu0 %v1507_v25 }
  0x1e   : > { %1396 = vmatpush3.bf16.msra.mxu1 %v1508_v26  ;;  %513 = vmatprep.subr.bf16.mxu0 %v1509_v27 }
  0x1f   : > { %1397 = vmatprep.subr.bf16.mxu1 %v1573_v5 }
  0x21   : > { %514 = vmatpush1.bf16.msra.mxu0 %v1511_v29 }
  0x22   : > { %1398 = vmatpush3.bf16.msra.mxu1 %v1512_v30  ;;  %515 = vmatprep.subr.bf16.mxu0 %v1513_v31 }
  0x23   : > { %1399 = vmatprep.subr.bf16.mxu1 %v1573_v5 }
  0x25   : > { %516 = vmatpush1.bf16.msra.mxu0 %v1515_v32 }
  0x26   : > { %1400 = vmatpush3.bf16.msra.mxu1 %v1516_v33  ;;  %517 = vmatprep.subr.bf16.mxu0 %v1517_v34 }
  0x27   : > { %1401 = vmatprep.subr.bf16.mxu1 %v1573_v5 }
  0x29   : > { %518 = vmatpush1.bf16.msra.mxu0 %v1519_v35 }
  0x2a   : > { %1402 = vmatpush3.bf16.msra.mxu1 %v1520_v36  ;;  %1431 = vmatprep.subr.bf16.mxu0 %v1573_v5 }
  0x2b   : > { %1407 = vmatprep.subr.bf16.mxu1 %v1573_v5 }
  0x9a   : > { %v287_v7 = vpop.xlane.xlu0 %286 }
  0x9b   : > { %v291_v8 = vmul.f32 0.0078125, %v287_v7 }
  0x9d   : > { %v1653_v9 = vsub.f32 %v1635_v1, %v291_v8 }
  0x9e   : > { %v289_v10 = vpop.xlane.xlu0 %288 }
  0x9f   : > { %v292_v11 = vmul.f32 0.0078125, %v289_v10  ;;  %v295_v12 = vmul.f32 %v1653_v9, %v1653_v9 }
  0xa1   : > { %v1658_v13 = vsub.f32 %v1638_v2, %v292_v11  ;;  %297 = vadd.xlane.f32.xlu1 %v295_v12  ;;  %v363_v11 = vrot.slane %v358_v59, %v362_v6 }
  0xa3   : > { %v296_v14 = vmul.f32 %v1658_v13, %v1658_v13 }
  0xa5   : > { %299 = vadd.xlane.f32.xlu1 %v296_v14 }
 0x12a   : > { %v298_v37 = vpop.xlane.xlu1 %297 }
 0x12b   : > { %v301_v38 = vmul.f32 0.0078125, %v298_v37 }
 0x12d   : > { %v303_v39 = vadd.f32 1e-05, %v301_v38 }
 0x12e   : > { %v300_v40 = vpop.xlane.xlu1 %299 }
 0x12f   : > { %1529 = vrsqrt.f32 %v303_v39  ;;  %v302_v41 = vmul.f32 0.0078125, %v300_v40 }
 0x131   : > { %v304_v42 = vadd.f32 1e-05, %v302_v41 }
 0x133   : > { %1531 = vrsqrt.f32 %v304_v42 }
 0x13c   : > { %v1530_v43 = vpop.eup %1529 }
 0x13d   : > { %v307_v44 = vmul.f32 %v1530_v43, %v1653_v9  ;;  %v370_v9 = vsub.s32 2, %v361_v55 }
 0x13f   : > { %v315_v48 = vmul.f32 %v1293_v45, %v307_v44 }
 0x140   : > { %v1532_v46 = vpop.eup %1531 }
 0x141   : > { %v308_v47 = vmul.f32 %v1532_v46, %v1658_v13  ;;  %v323_v51 = vadd.f32 %v1294_v49, %v315_v48  ;;  %v371_v13 = vrot.slane %v358_v59, %v370_v9 }
 0x143   : > { %v316_v50 = vmul.f32 %v1293_v45, %v308_v47 }
 0x145   : > { %v324_v52 = vadd.f32 %v1294_v49, %v316_v50 }
 0x147   : > { %v325_v53 = vpack.c.bf16 %v324_v52, %v323_v51 }
 0x149   : > { %536 = vmatmul.mubr.bf16.vlgmr.msra.gmra.mxu0 %v325_v53  ;;  %1404 = vmatmul.mubr.bf16.vlgmr.msra.gmra.mxu1 %v325_v53 }
 0x14a   : > { %1409 = vmatprep.mubr.msk.bf16.mxu1 %vm1575_vm0, %v1573_v5  ;;  %1433 = vmatprep.mubr.msk.bf16.mxu0 %vm1575_vm0, %v1573_v5 }
 0x209   : > { %v537_v57 = vpop.f32.mrf.mxu0  ;;  %v580_v58 = vpop.f32.mrf.mxu1 }
 0x20a   : > { %v538_v16 = vadd.f32 %v537_v57, %v363_v11  ;;  %v581_v17 = vadd.f32 %v580_v58, %v371_v13 }
 0x20b   : > { %v539_v60 = vpop.f32.mrf.mxu0  ;;  %v1405_v61 = vpop.f32.mrf.mxu1 }
 0x20c   : > { %v540_v7 = vadd.f32 %v539_v60, %v367_v62 }
 0x20d   : > { %v541_v63 = vpop.f32.mrf.mxu0  ;;  %v583_v0 = vpop.f32.mrf.mxu1 }
 0x20e   : > { %v542_v14 = vadd.f32 %v541_v63, %v363_v11  ;;  %v584_v15 = vadd.f32 %v583_v0, %v371_v13 }
 0x20f   : > { %v543_v3 = vpop.f32.mrf.mxu0  ;;  %v1406_v4 = vpop.f32.mrf.mxu1 }
 0x210   : > { %v544_v8 = vadd.f32 %v543_v3, %v367_v62  ;;  %v587_v18 = vpack.c.bf16 %v542_v14, %v538_v16  ;;  %v1752_v19 = vpack.c.bf16 %v584_v15, %v581_v17 }
 0x212   : > { %v588_v10 = vpack.c.bf16 %v544_v8, %v540_v7 }
 0x214   : > { %v595_v12 = vsel %vm590_vm1, %v588_v10, 0 }
 0x215   : > { %1408 = vmatpush3.bf16.xpose.msra.mxu1 %v595_v12 }
 0x216   : > { %1413 = vmatprep.subr.bf16.mxu1 %v1573_v5 }
 0x21c   : > { %1410 = vmatmul.mubr.msk.bf16.vlgmr.msra.gmra.mxu1 %vm590_vm1, %v587_v18 }
 0x21d   : > { %1414 = vmatpush3.bf16.msra.mxu1 %v1752_v19  ;;  %1415 = vmatprep.mubr.msk.bf16.mxu1 %vm1575_vm0, %v1573_v5 }
 0x21e   : > { %1419 = vmatprep.subr.bf16.mxu1 %v1573_v5 }
 0x2dc   : > { %v631_v20 = vpop.f32.mrf.mxu1 }
 0x2dd   : > { %v638_v21 = vmul.f32 0.17677669, %v631_v20 }
 0x2de   : > { %v1411_v22 = vpop.f32.mrf.mxu1 }
 0x2df   : > { %v641_v23 = vsel %vm640_vm2, %v638_v21, -inf }
 0x2e0   : > { %642 = vmax.xlane.f32.xlu0 %v641_v23  ;;  %v634_v24 = vpop.f32.mrf.mxu1 }
 0x2e1   : > { %v639_v25 = vmul.f32 0.17677669, %v634_v24 }
 0x2e2   : > { %v1412_v26 = vpop.f32.mrf.mxu1 }
 0x2e3   : > { %v644_v27 = vsel %vm640_vm2, %v639_v25, -inf }
 0x2e4   : > { %645 = vmax.xlane.f32.xlu1 %v644_v27 }
 0x369   : > { %v643_v28 = vpop.xlane.xlu0 %642 }
 0x36a   : > { %v647_v29 = vsub.f32 %v638_v21, %v643_v28 }
 0x36c   : > { %v649_v30 = vmul.f32 1.442695, %v647_v29 }
 0x36d   : > { %v646_v31 = vpop.xlane.xlu1 %645 }
 0x36e   : > { %1533 = vpow2.f32 %v649_v30  ;;  %v648_v32 = vsub.f32 %v639_v25, %v646_v31 }
 0x370   : > { %v651_v33 = vmul.f32 1.442695, %v648_v32 }
 0x372   : > { %1535 = vpow2.f32 %v651_v33 }
 0x37b   : > { %v1534_v34 = vpop.eup %1533 }
 0x37c   : > { %v653_v35 = vsel %vm640_vm2, %v1534_v34, 0.0 }
 0x37d   : > { %654 = vadd.xlane.f32.xlu0 %v653_v35 }
 0x37f   : > { %v1536_v36 = vpop.eup %1535 }
 0x380   : > { %v656_v37 = vsel %vm640_vm2, %v1536_v36, 0.0 }
 0x381   : > { %657 = vadd.xlane.f32.xlu1 %v656_v37 }
 0x392   : > { %710 = vrot.lane.b32.xlu1 %v587_v18, %s1576_s21 }
 0x393   : > { %713 = vrot.lane.b32.xlu0 %v588_v10, %s1576_s21 }
 0x396   : > { %838 = vrot.lane.b32.xlu1 %v588_v10, %s1577_s22 }
 0x397   : > { %962 = vrot.lane.b32.xlu0 %v588_v10, %s1578_s23 }
 0x39a   : > { %836 = vrot.lane.b32.xlu1 %v587_v18, %s1577_s22 }
 0x39e   : > { %960 = vrot.lane.b32.xlu1 %v587_v18, %s1578_s23 }
 0x406   : > { %v655_v38 = vpop.xlane.xlu0 %654 }
 0x407   : > { %1537 = vrcp.f32 %v655_v38 }
 0x40a   : > { %v658_v39 = vpop.xlane.xlu1 %657  ;;  %v714_v41 = vpop.permute.xlu0 %713 }
 0x40b   : > { %1539 = vrcp.f32 %v658_v39  ;;  %v719_v52 = vsel %vm590_vm1, %v714_v41, 0 }
 0x40e   : > { %v711_v40 = vpop.permute.xlu1 %710  ;;  %v963_v46 = vpop.permute.xlu0 %962 }
 0x40f   : > { %v968_v50 = vsel %vm590_vm1, %v963_v46, 0 }
 0x412   : > { %v839_v42 = vpop.permute.xlu1 %838 }
 0x413   : > { %v844_v43 = vsel %vm590_vm1, %v839_v42, 0 }
 0x414   : > { %1432 = vmatpush3.bf16.xpose.msra.mxu0 %v844_v43  ;;  %v1538_v44 = vpop.eup %1537 }
 0x415   : > { %1443 = vmatprep.subr.bf16.mxu0 %v1573_v5  ;;  %v661_v47 = vmul.f32 %v1538_v44, %v1534_v34 }
 0x416   : > { %v837_v49 = vpop.permute.xlu1 %836 }
 0x418   : > { %v1540_v45 = vpop.eup %1539 }
 0x419   : > { %v662_v48 = vmul.f32 %v1540_v45, %v1536_v36 }
 0x41a   : > { %v961_v53 = vpop.permute.xlu1 %960 }
 0x41b   : > { %1434 = vmatmul.mubr.msk.bf16.vlgmr.msra.gmra.mxu0 %vm590_vm1, %v837_v49  ;;  %v663_v51 = vpack.c.bf16 %v662_v48, %v661_v47 }
 0x41c   : > { %1444 = vmatpush3.bf16.xpose.msra.mxu0 %v968_v50  ;;  %1445 = vmatprep.mubr.msk.bf16.mxu0 %vm1575_vm0, %v1573_v5 }
 0x41d   : > { %1416 = vmatmul.mubr.msk.bf16.vlgmr.msra.gmra.mxu1 %vm640_vm2, %v663_v51  ;;  %1455 = vmatprep.subr.bf16.mxu0 %v1573_v5 }
 0x41e   : > { %1420 = vmatpush3.bf16.xpose.msra.mxu1 %v719_v52  ;;  %1421 = vmatprep.mubr.msk.bf16.mxu1 %vm1575_vm0, %v1573_v5 }
 0x41f   : > { %1425 = vmatprep.subr.bf16.mxu1 %v1573_v5 }
 0x423   : > { %1446 = vmatmul.mubr.msk.bf16.vlgmr.msra.gmra.mxu0 %vm590_vm1, %v961_v53 }
 0x424   : > { %1471 = vmatprep.mubr.msk.bf16.mxu0 %vm1575_vm0, %v1573_v5 }
 0x425   : > { %1422 = vmatmul.mubr.msk.bf16.vlgmr.msra.gmra.mxu1 %vm590_vm1, %v711_v40 }
 0x426   : > { %1427 = vmatprep.mubr.msk.bf16.mxu1 %vm1575_vm0, %v1573_v5 }
 0x4db   : > { %v880_v54 = vpop.f32.mrf.mxu0 }
 0x4dc   : > { %v887_v8 = vmul.f32 0.17677669, %v880_v54 }
 0x4dd   : > { %v1787_v55 = vpop.f32.mrf.mxu1  ;;  %v1435_v56 = vpop.f32.mrf.mxu0 }
 0x4de   : > { %v889_v16 = vsel %vm640_vm2, %v887_v8, -inf }
 0x4df   : > { %v1417_v57 = vpop.f32.mrf.mxu1  ;;  %v883_v58 = vpop.f32.mrf.mxu0 }
 0x4e0   : > { %v888_v14 = vmul.f32 0.17677669, %v883_v58 }
 0x4e1   : > { %v1789_v59 = vpop.f32.mrf.mxu1  ;;  %v1436_v60 = vpop.f32.mrf.mxu0 }
 0x4e2   : > { %v708_v61 = vpack.c.bf16 %v1789_v59, %v1787_v55  ;;  %v892_v20 = vsel %vm640_vm2, %v888_v14, -inf }
 0x4e3   : > { %v1418_v62 = vpop.f32.mrf.mxu1  ;;  %v1004_v63 = vpop.f32.mrf.mxu0 }
 0x4e4   : > { %v1011_v18 = vmul.f32 0.17677669, %v1004_v63 }
 0x4e5   : > { %v755_v0 = vpop.f32.mrf.mxu1  ;;  %v1447_v3 = vpop.f32.mrf.mxu0 }
 0x4e6   : > { %v762_v4 = vmul.f32 0.17677669, %v755_v0  ;;  %v1013_v22 = vsel %vm640_vm2, %v1011_v18, -inf }
 0x4e7   : > { %v1423_v6 = vpop.f32.mrf.mxu1  ;;  %v1007_v7 = vpop.f32.mrf.mxu0 }
 0x4e8   : > { %v764_v9 = vsel %vm640_vm2, %v762_v4, -inf  ;;  %v1012_v15 = vmul.f32 0.17677669, %v1007_v7 }
 0x4e9   : > { %v1448_v10 = vpop.f32.mrf.mxu0  ;;  %765 = vmax.xlane.f32.xlu0 %v764_v9  ;;  %v758_v11 = vpop.f32.mrf.mxu1 }
 0x4ea   : > { %v763_v12 = vmul.f32 0.17677669, %v758_v11  ;;  %v1016_v21 = vsel %vm640_vm2, %v1012_v15, -inf }
 0x4eb   : > { %v1424_v13 = vpop.f32.mrf.mxu1 }
 0x4ec   : > { %v767_v17 = vsel %vm640_vm2, %v763_v12, -inf }
 0x4ed   : > { %890 = vmax.xlane.f32.xlu0 %v889_v16  ;;  %768 = vmax.xlane.f32.xlu1 %v767_v17 }
 0x4f1   : > { %893 = vmax.xlane.f32.xlu0 %v892_v20  ;;  %1017 = vmax.xlane.f32.xlu1 %v1016_v21  ;;  %v1522_v20 = vld [vmem:[%s1876_s5 + $0x30] sm:$0xff]   ;;  %v1523_v21 = vld [vmem:[%s1876_s5 + $0x28] sm:$0xff]  }
 0x4f5   : > { %1014 = vmax.xlane.f32.xlu0 %v1013_v22  ;;  %v1524_v22 = vld [vmem:[%s1876_s5 + $0x20] sm:$0xff]  }
 0x572   : > { %v766_v23 = vpop.xlane.xlu0 %765 }
 0x573   : > { %v770_v32 = vsub.f32 %v762_v4, %v766_v23  ;;  %v1525_v23 = vld [vmem:[%s1876_s5 + $0x18] sm:$0xff]  }
 0x575   : > { %v772_v38 = vmul.f32 1.442695, %v770_v32 }
 0x576   : > { %v891_v24 = vpop.xlane.xlu0 %890  ;;  %v769_v25 = vpop.xlane.xlu1 %768 }
 0x577   : > { %v895_v26 = vsub.f32 %v887_v8, %v891_v24  ;;  %v771_v33 = vsub.f32 %v763_v12, %v769_v25  ;;  %v1526_v24 = vld [vmem:[%s1876_s5 + $0x10] sm:$0xff]  }
 0x579   : > { %v897_v27 = vmul.f32 1.442695, %v895_v26  ;;  %v774_v39 = vmul.f32 1.442695, %v771_v33 }
 0x57a   : > { %v894_v28 = vpop.xlane.xlu0 %893  ;;  %v1018_v29 = vpop.xlane.xlu1 %1017 }
 0x57b   : > { %1541 = vpow2.f32 %v897_v27  ;;  %v896_v30 = vsub.f32 %v888_v14, %v894_v28  ;;  %v1020_v31 = vsub.f32 %v1012_v15, %v1018_v29  ;;  %v1527_v27 = vld [vmem:[%s1876_s5 + $0x8] sm:$0xff]   ;;  %v1528_v29 = vld [vmem:[%s1876_s5] sm:$0xff]  }
 0x57d   : > { %v899_v34 = vmul.f32 1.442695, %v896_v30  ;;  %v1023_v35 = vmul.f32 1.442695, %v1020_v31 }
 0x57e   : > { %v1015_v36 = vpop.xlane.xlu0 %1014 }
 0x57f   : > { %1543 = vpow2.f32 %v899_v34  ;;  %v1019_v37 = vsub.f32 %v1011_v18, %v1015_v36  ;;  %v1521_v18 = vld [vmem:[%s1876_s5 + $0x38] sm:$0xff]  }
 0x580   : > { %1545 = vpow2.f32 %v1023_v35  ;;  %1456 = vmatpush3.bf16.msra.mxu0 %v1521_v18 }
 0x581   : > { %v1021_v40 = vmul.f32 1.442695, %v1019_v37  ;;  %1457 = vmatprep.subr.bf16.mxu0 %v1573_v5 }
 0x583   : > { %1547 = vpow2.f32 %v1021_v40 }
 0x584   : > { %1549 = vpow2.f32 %v772_v38  ;;  %1458 = vmatpush3.bf16.msra.mxu0 %v1522_v20 }
 0x585   : > { %1551 = vpow2.f32 %v774_v39  ;;  %1459 = vmatprep.subr.bf16.mxu0 %v1573_v5 }
 0x588   : > { %v1542_v41 = vpop.eup %1541  ;;  %1460 = vmatpush3.bf16.msra.mxu0 %v1523_v21 }
 0x589   : > { %v901_v42 = vsel %vm640_vm2, %v1542_v41, 0.0  ;;  %1461 = vmatprep.subr.bf16.mxu0 %v1573_v5 }
 0x58a   : > { %902 = vadd.xlane.f32.xlu0 %v901_v42 }
 0x58c   : > { %v1544_v43 = vpop.eup %1543  ;;  %1462 = vmatpush3.bf16.msra.mxu0 %v1524_v22 }
 0x58d   : > { %v904_v44 = vsel %vm640_vm2, %v1544_v43, 0.0  ;;  %v1546_v45 = vpop.eup %1545  ;;  %1463 = vmatprep.subr.bf16.mxu0 %v1573_v5 }
 0x58e   : > { %905 = vadd.xlane.f32.xlu1 %v904_v44  ;;  %v1028_v49 = vsel %vm640_vm2, %v1546_v45, 0.0 }
 0x590   : > { %v1548_v46 = vpop.eup %1547  ;;  %1464 = vmatpush3.bf16.msra.mxu0 %v1525_v23 }
 0x591   : > { %v1550_v47 = vpop.eup %1549  ;;  %v1025_v48 = vsel %vm640_vm2, %v1548_v46, 0.0  ;;  %1465 = vmatprep.subr.bf16.mxu0 %v1573_v5 }
 0x592   : > { %v1552_v50 = vpop.eup %1551  ;;  %1026 = vadd.xlane.f32.xlu0 %v1025_v48  ;;  %1029 = vadd.xlane.f32.xlu1 %v1028_v49  ;;  %v776_v51 = vsel %vm640_vm2, %v1550_v47, 0.0 }
 0x593   : > { %v779_v52 = vsel %vm640_vm2, %v1552_v50, 0.0 }
 0x594   : > { %1466 = vmatpush3.bf16.msra.mxu0 %v1526_v24 }
 0x595   : > { %1467 = vmatprep.subr.bf16.mxu0 %v1573_v5 }
 0x596   : > { %777 = vadd.xlane.f32.xlu0 %v776_v51  ;;  %780 = vadd.xlane.f32.xlu1 %v779_v52 }
 0x598   : > { %1468 = vmatpush3.bf16.msra.mxu0 %v1527_v27 }
 0x599   : > { %1469 = vmatprep.subr.bf16.mxu0 %v1573_v5 }
 0x59c   : > { %1470 = vmatpush3.bf16.msra.mxu0 %v1528_v29 }
 0x5a7   : > { %912 = vrot.lane.b32.xlu1 %v1752_v19, %s1577_s22 }
 0x5ab   : > { %1036 = vrot.lane.b32.xlu1 %v1752_v19, %s1578_s23 }
 0x5ac   : > { %788 = vrot.lane.b32.xlu0 %v1752_v19, %s1576_s21 }
 0x613   : > { %v903_v53 = vpop.xlane.xlu0 %902 }
 0x617   : > { %v906_v54 = vpop.xlane.xlu1 %905 }
 0x61b   : > { %v1027_v56 = vpop.xlane.xlu0 %1026  ;;  %v1030_v57 = vpop.xlane.xlu1 %1029 }
 0x61f   : > { %v778_v58 = vpop.xlane.xlu0 %777  ;;  %v781_v60 = vpop.xlane.xlu1 %780 }
 0x620   : > { %1553 = vrcp.f32 %v778_v58 }
 0x621   : > { %1555 = vrcp.f32 %v781_v60 }
 0x622   : > { %1557 = vrcp.f32 %v906_v54 }
 0x623   : > { %v789_v62 = vpop.permute.xlu0 %788  ;;  %1559 = vrcp.f32 %v903_v53  ;;  %v913_v7 = vpop.permute.xlu1 %912 }
 0x624   : > { %1426 = vmatpush3.bf16.msra.mxu1 %v789_v62  ;;  %1561 = vrcp.f32 %v1027_v56 }
 0x625   : > { %1437 = vmatprep.subr.bf16.mxu1 %v1573_v5  ;;  %1563 = vrcp.f32 %v1030_v57 }
 0x627   : > { %v1037_v14 = vpop.permute.xlu1 %1036 }
 0x62d   : > { %v1554_v63 = vpop.eup %1553 }
 0x62e   : > { %v1556_v0 = vpop.eup %1555  ;;  %v784_v3 = vmul.f32 %v1554_v63, %v1550_v47  ;;  %v1327_v47 = vld [vmem:[%s1877_s6] ss:$0 sm:$0xff] }
 0x62f   : > { %v785_v19 = vmul.f32 %v1556_v0, %v1552_v50  ;;  %v1558_v6 = vpop.eup %1557  ;;  %v1110_v49 = vadd.f32 %v1635_v1, %v1327_v47  ;;  %v1111_v50 = vadd.f32 %v1638_v2, %v1327_v47 }
 0x630   : > { %v1560_v8 = vpop.eup %1559  ;;  %v910_v9 = vmul.f32 %v1558_v6, %v1544_v43 }
 0x631   : > { %v786_v4 = vpack.c.bf16 %v785_v19, %v784_v3  ;;  %v909_v10 = vmul.f32 %v1560_v8, %v1542_v41  ;;  %v1562_v11 = vpop.eup %1561 }
 0x632   : > { %v1564_v13 = vpop.eup %1563  ;;  %v1033_v15 = vmul.f32 %v1562_v11, %v1548_v46 }
 0x633   : > { %1428 = vmatmul.mubr.msk.bf16.vlgmr.msra.gmra.mxu1 %vm640_vm2, %v786_v4  ;;  %v911_v12 = vpack.c.bf16 %v910_v9, %v909_v10  ;;  %v1034_v16 = vmul.f32 %v1564_v13, %v1546_v45 }
 0x634   : > { %1438 = vmatpush3.bf16.msra.mxu1 %v913_v7  ;;  %1439 = vmatprep.mubr.msk.bf16.mxu1 %vm1575_vm0, %v1573_v5 }
 0x635   : > { %1449 = vmatprep.subr.bf16.mxu1 %v1573_v5  ;;  %v1035_v17 = vpack.c.bf16 %v1034_v16, %v1033_v15 }
 0x63b   : > { %1440 = vmatmul.mubr.msk.bf16.vlgmr.msra.gmra.mxu1 %vm640_vm2, %v911_v12 }
 0x63c   : > { %1450 = vmatpush3.bf16.msra.mxu1 %v1037_v14  ;;  %1451 = vmatprep.mubr.msk.bf16.mxu1 %vm1575_vm0, %v1573_v5 }
 0x643   : > { %1452 = vmatmul.mubr.msk.bf16.vlgmr.msra.gmra.mxu1 %vm640_vm2, %v1035_v17 }
 0x6f3   : > { %v828_v25 = vpop.f32.mrf.mxu1 }
 0x6f5   : > { %v1429_v26 = vpop.f32.mrf.mxu1 }
 0x6f7   : > { %v831_v28 = vpop.f32.mrf.mxu1 }
 0x6f8   : > { %v835_v30 = vpack.c.bf16 %v831_v28, %v828_v25 }
 0x6f9   : > { %v1430_v31 = vpop.f32.mrf.mxu1 }
 0x6fa   : > { %1085 = vrot.lane.b32.xlu1 %v835_v30, %s1578_s23 }
 0x6fb   : > { %v952_v32 = vpop.f32.mrf.mxu1 }
 0x6fd   : > { %v1441_v33 = vpop.f32.mrf.mxu1 }
 0x6ff   : > { %v955_v34 = vpop.f32.mrf.mxu1 }
 0x700   : > { %v959_v35 = vpack.c.bf16 %v955_v34, %v952_v32 }
 0x701   : > { %v1442_v36 = vpop.f32.mrf.mxu1 }
 0x702   : > { %1088 = vrot.lane.b32.xlu0 %v959_v35, %s1577_s22 }
 0x703   : > { %v1076_v37 = vpop.f32.mrf.mxu1 }
 0x705   : > { %v1453_v38 = vpop.f32.mrf.mxu1 }
 0x707   : > { %v1079_v39 = vpop.f32.mrf.mxu1 }
 0x708   : > { %v1083_v40 = vpack.c.bf16 %v1079_v39, %v1076_v37 }
 0x709   : > { %v1454_v41 = vpop.f32.mrf.mxu1 }
 0x70a   : > { %1091 = vrot.lane.b32.xlu1 %v1083_v40, %s1576_s21 }
 0x76c   : > { %v1086_v42 = vpop.permute.xlu1 %1085 }
 0x76d   : > { %v1095_v43 = vsel %vm590_vm1, %v708_v61, %v1086_v42 }
 0x774   : > { %v1089_v5 = vpop.permute.xlu0 %1088 }
 0x775   : > { %v1098_v44 = vsel %vm1096_vm3, %v1095_v43, %v1089_v5 }
 0x77c   : > { %v1092_v45 = vpop.permute.xlu1 %1091 }
 0x77d   : > { %v1101_v46 = vsel %vm1099_vm4, %v1098_v44, %v1092_v45 }
 0x77e   : > { %1472 = vmatmul.mubr.bf16.vlgmr.msra.gmra.mxu0 %v1101_v46 }
 0x83e   : > { %v1210_v48 = vpop.f32.mrf.mxu0 }
 0x83f   : > { %v1217_v53 = vadd.f32 %v1210_v48, %v1110_v49 }
 0x840   : > { %v1473_v51 = vpop.f32.mrf.mxu0 }
 0x842   : > { %v1213_v52 = vpop.f32.mrf.mxu0 }
 0x843   : > { %v1218_v54 = vadd.f32 %v1213_v52, %v1111_v50 }
 0x844   : > { %v1474_v55 = vpop.f32.mrf.mxu0 }
 0x845   : > { %v1351_v59 = vpack.c.bf16 %v1218_v54, %v1217_v53 }
 0x847   : > { %1352 = vst [vmem:[%s278_s27] sm:$0xff] %v1351_v59  }
 0x848 PF: > { %s17_s24 = sadd.s32 1, %s1571_s24  }
 0x849   : > { %p14_p4 = scmp.ge.s32.totalorder %s17_s24, 4  }
 0x84b   :  { %16 = sbr.rel (!%p14_p4) target bundleno = 1 (0x1), region = 78 }

// kernel: vit_backbone_forward.11
= control target key start
LH: loop header
LB: loop body
LE: loop exit
PB: predicated region body
PF: predicated region fallthrough
CT: control target
= control target key end

     0   :  { %8 = vsyncpa [#allocation3], 0  ;;  %s526_s0 = inlined_call_operand.vmem [shape: bf16[2,16,128], index: 0, kind: input, shape index: {}]   ;;  %s527_s1 = inlined_call_operand.vmem [shape: f32[1,128], index: 1, kind: input, shape index: {}]   ;;  %s528_s2 = inlined_call_operand.vmem [shape: f32[1,128], index: 2, kind: input, shape index: {}]   ;;  %s529_s3 = inlined_call_operand.hbm [shape: f32[2,1,128], index: 3, kind: output, shape index: {}]  }
   0x1   :  { %10 = vsyncpa [#allocation3 + $0x1], 0  ;;  %s433_s12 = smov 0   ;;  %s435_s13 = smov 0  }
   0x2   :  { %s437_s14 = smov 0   ;;  %s439_s15 = smov 0  }
   0x3 LB: > { %s454_s16 = sadd.s32 4294967295, %s410_s15   ;;  %s291_s17 = sadd.s32 4294967294, %s410_s15   ;;  %s410_s15 = sphi %s439_s15, %s535_s15   ;;  %s406_s14 = sphi %s437_s14, %s534_s14   ;;  %s402_s13 = sphi %s435_s13, %s533_s13   ;;  %s398_s12 = sphi %s433_s12, %s532_s12  }
   0x4   : > { %s458_s18 = sadd.s32 1, %s410_s15   ;;  %s91_s19 = sadd.s32 1, %s406_s14 }
   0x5   : > { %s88_s20 = ssub.s32 %s410_s15, %s458_s18  ;;  %p101_p0 = scmp.ne.s32.totalorder %s406_s14, %s402_s13 }
   0x6   : > { %p89_p1 = scmp.eq.s32.totalorder %s88_s20, 0  ;;  %p102_p2 = scmp.eq.s32.totalorder %s454_s16, 1 }
   0x7   : > { %p107_p3 = scmp.ne.s32.totalorder %s402_s13, %s398_s12  ;;  %p108_p4 = scmp.eq.s32.totalorder %s291_s17, 1 }
   0x8   : > { %s469_s21 = scalar_select %p89_p1, %s406_s14, %s91_s19  }
   0x9   : > { %p471_p5 = por %p102_p2, %p101_p0  ;;  %p475_p6 = por %p108_p4, %p107_p3 }
   0xa   : > { %p294_p7 = scmp.ge.s32.totalorder %s410_s15, 1  ;;  %p140_p8 = scmp.lt.s32.totalorder %s410_s15, 3 }
   0xc   : > { %p141_p9 = pnand %p294_p7, %p140_p8 }
   0xd   : > { %p163_p10 = scmp.lt.s32.totalorder (!%p141_p9), %s454_s16, 1  ;;  %s161_s6 = sand.u32 (!%p141_p9), 1, %s402_s13  }
   0xe   : > { %144 = sbr.rel (%p141_p9) target bundleno = 365 (0x16d), region = 32  ;;  %s299_s7 = sshll.u32 (!%p141_p9), %s454_s16, 4 }
   0xf   : > { %s162_s8 = scalar_lea.vmem (!%p141_p9), [#allocation2], %s161_s6  ;;  %s234_s17 = scalar_lea.hbm (!%p141_p9), %s529_s3, %s299_s7 }
  0x10   : > { %s236_s9 = sshll.u32 (!%p141_p9), %s162_s8, 4  ;;  %s224_s19 = scalar_lea.sflag (!%p141_p9), [#allocation3], %s161_s6  ;;  %s237_s9 = int_to_ptr.vmem [resolvable:$true] %s236_s9 }
  0x11   : > { %s350_s20 = scalar_lea.vmem (!%p141_p9), %s237_s9, 16 }
  0x12   : > { %p351_p11 = scmp.ne.s32.totalorder (!%p141_p9), %s237_s9, %s350_s20 }
  0x13   : > { %s164_s24 = scalar_select %p163_p10, %s454_s16, 1  ;;  %v297_v19 = vld [vmem:[%s527_s1] ss:$0 sm:$0xff] }
  0x14   : > { %v298_v23 = vld [vmem:[%s528_s2] ss:$0 sm:$0xff]  ;;  %p352_p12 = pnand %p351_p11, %p471_p5 }
  0x15   : > { %s302_s25 = sshll.u32 %s164_s24, 3  ;;  %s412_s24 = smov [#allocation2]  }
  0x16   : > { %s167_s28 = scalar_lea.vmem %s526_s0, %s302_s25  ;;  %p353_p13 = pneg %p352_p12 }
  0x17   : > { %v304_v0 = vld [vmem:[%s167_s28] sm:$0xff]   ;;  %s354_s25 = sshll.u32 %s412_s24, 4  ;;  %s355_s25 = int_to_ptr.vmem [resolvable:$false] %s354_s25 }
  0x18   : > { %v305_v1 = vunpack.c.l.bf16 %v304_v0  ;;  %v306_v2 = vunpack.c.h.bf16 %v304_v0  ;;  %s356_s16 = scalar_lea.vmem %s355_s25, 32  ;;  %p357_p0 = scmp.lt.s32.totalorder %s237_s9, %s355_s25 }
  0x19   : > { %p358_p1 = scmp.lt.s32.totalorder %s356_s16, %s350_s20 }
  0x1a   : > { %174 = vadd.xlane.f32.xlu0 %v305_v1 }
  0x1b   : > { %p359_p2 = por %p358_p1, %p357_p0 }
  0x1d   : > { %p360_p3 = pnand %p359_p2, %p353_p13 }
  0x1e   : > { %176 = vadd.xlane.f32.xlu0 %v306_v2 }
  0xa3   : > { %v175_v3 = vpop.xlane.xlu0 %174 }
  0xa4   : > { %v179_v4 = vmul.f32 0.0078125, %v175_v3 }
  0xa6   : > { %v181_v5 = vsub.f32 %v305_v1, %v179_v4 }
  0xa7   : > { %v177_v6 = vpop.xlane.xlu0 %176 }
  0xa8   : > { %v180_v7 = vmul.f32 0.0078125, %v177_v6  ;;  %v183_v8 = vmul.f32 %v181_v5, %v181_v5 }
  0xaa   : > { %v182_v9 = vsub.f32 %v306_v2, %v180_v7  ;;  %185 = vadd.xlane.f32.xlu1 %v183_v8 }
  0xac   : > { %v184_v10 = vmul.f32 %v182_v9, %v182_v9 }
  0xae   : > { %187 = vadd.xlane.f32.xlu1 %v184_v10 }
 0x133   : > { %v186_v11 = vpop.xlane.xlu1 %185 }
 0x134   : > { %v189_v12 = vmul.f32 0.0078125, %v186_v11 }
 0x136   : > { %v191_v13 = vadd.f32 1e-05, %v189_v12 }
 0x137   : > { %v188_v14 = vpop.xlane.xlu1 %187 }
 0x138   : > { %346 = vrsqrt.f32 %v191_v13  ;;  %v190_v15 = vmul.f32 0.0078125, %v188_v14 }
 0x13a   : > { %v192_v16 = vadd.f32 1e-05, %v190_v15 }
 0x13c   : > { %348 = vrsqrt.f32 %v192_v16 }
 0x145   : > { %v347_v17 = vpop.eup %346 }
 0x146   : > { %v195_v18 = vmul.f32 %v347_v17, %v181_v5 }
 0x148   : > { %v203_v22 = vmul.f32 %v297_v19, %v195_v18 }
 0x149   : > { %v349_v20 = vpop.eup %348 }
 0x14a   : > { %v196_v21 = vmul.f32 %v349_v20, %v182_v9  ;;  %v211_v25 = vadd.f32 %v298_v23, %v203_v22 }
 0x14c   : > { %v204_v24 = vmul.f32 %v297_v19, %v196_v21 }
 0x14e   : > { %v212_v26 = vadd.f32 %v298_v23, %v204_v24 }
 0x150   : > { %v213_v27 = vadd.f32 %v212_v26, %v211_v25 }
 0x152   : > { %v214_v28 = vrot.slane %v213_v27, 4 }
 0x154   : > { %v215_v29 = vadd.f32 %v214_v28, %v213_v27 }
 0x156   : > { %v216_v30 = vrot.slane %v215_v29, 2 }
 0x158   : > { %v217_v31 = vadd.f32 %v216_v30, %v215_v29 }
 0x15a   : > { %v218_v32 = vrot.slane %v217_v31, 1 }
 0x15c   : > { %v219_v33 = vadd.f32 %v218_v32, %v217_v31 }
 0x15e   : > { %v221_v34 = vmul.f32 0.0625, %v219_v33 }
 0x160   : > { %222 = vst [vmem:[%s162_s8] sm:$0x1] %v221_v34 }
 0x161   : > { %363 = shalt.err (!%p360_p3)
}
 0x162   : > { %s364_s26 = scalar_lea.hbm %s234_s17, 16  ;;  %s368_s29 = scalar_lea.hbm %s529_s3, 32 }
 0x163   : > { %p365_p4 = scmp.ne.s32.totalorder %s234_s17, %s364_s26  ;;  %p369_p9 = scmp.lt.s32.totalorder %s234_s17, %s529_s3 }
 0x164   : > { %p370_p10 = scmp.lt.s32.totalorder %s368_s29, %s364_s26 }
 0x165   : > { %p366_p7 = pnand %p365_p4, %p471_p5 }
 0x166   : > { %p371_p11 = por %p370_p10, %p369_p9 }
 0x167   : > { %p367_p8 = pneg %p366_p7 }
 0x169   : > { %p372_p12 = pnand %p371_p11, %p367_p8 }
 0x16b   : > { %375 = shalt.err (!%p372_p12)
}
 0x16c   : > { %307 = dma.vmem_to_hbm [thread:$0]  (%p471_p5), %s237_s9, 16, %s234_s17, %s224_s19  }
 0x16d PF: > { %p313_p13 = scmp.ge.s32.totalorder %s410_s15, 2  ;;  %s248_s5 = sand.u32 1, %s398_s12  }
 0x16e   : > { %s249_s6 = scalar_lea.sflag [#allocation3], %s248_s5 }
 0x16f   : > { %p310_p0 = pnand %p313_p13, %p475_p6 }
 0x171   : > { %p311_p1 = pneg %p310_p0 }
 0x173   : > { %393 = dma.done.wait (%p311_p1), %s249_s6, 16  }
 0x174   : > { %395 = vsyncadd (%p311_p1), %s249_s6, 4294967280  ;;  %p13_p2 = scmp.ge.s32.totalorder %s458_s18, 4   ;;  %s532_s12 = smov %s402_s13 }
 0x175   : > { %s533_s13 = smov %s406_s14  ;;  %s534_s14 = smov %s469_s21 }
 0x176   : > { %s535_s15 = smov %s458_s18  ;;  %15 = sbr.rel (!%p13_p2) target bundleno = 3 (0x3), region = 67 }
 0x17b   :  { %253 = vsyncpa [#allocation3], 1 }
 0x17c   :  { %255 = vsyncpa [#allocation3 + $0x1], 1 }

// kernel: vit_backbone_forward.8
= control target key start
LH: loop header
LB: loop body
LE: loop exit
PB: predicated region body
PF: predicated region fallthrough
CT: control target
= control target key end

     0   :  { %s1835_s24 = smov 0   ;;  %s1837_s25 = smov 0   ;;  %s2226_s0 = inlined_call_operand.vmem [shape: bf16[2,16,128], index: 0, kind: input, shape index: {}]   ;;  %s2227_s1 = inlined_call_operand.vmem [shape: f32[1,128], index: 1, kind: input, shape index: {}]   ;;  %s2228_s2 = inlined_call_operand.vmem [shape: f32[1,128], index: 2, kind: input, shape index: {}]   ;;  %s2229_s3 = inlined_call_operand.vmem [shape: bf16[128,512], index: 3, kind: input, shape index: {}]   ;;  %s2230_s4 = inlined_call_operand.vmem [shape: f32[1,512], index: 4, kind: input, shape index: {}]   ;;  %s2231_s5 = inlined_call_operand.vmem [shape: bf16[512,128], index: 5, kind: input, shape index: {}]   ;;  %s2232_s6 = inlined_call_operand.vmem [shape: f32[1,128], index: 6, kind: input, shape index: {}]   ;;  %s2233_s7 = inlined_call_operand.vmem [shape: bf16[2,16,128], index: 7, kind: output, shape index: {}]  }
   0x1   :  { %s1839_s26 = smov 0  }
   0x2 LB: > { %s36_s27 = sadd.s32 1, %s1788_s25  ;;  %p1485_p0 = scmp.ge.s32.totalorder %s1792_s26, 1  ;;  %s1792_s26 = sphi %s1839_s26, %s17_s26   ;;  %s1788_s25 = sphi %s1837_s25, %s2235_s25   ;;  %s1784_s24 = sphi %s1835_s24, %s2234_s24  }
   0x3   : > { %p38_p1 = scmp.ge.s32.totalorder %s36_s27, 2  ;;  %p297_p2 = scmp.lt.s32.totalorder %s1792_s26, 3 }
   0x5   : > { %s2237_s27 = smov (%p38_p1, %s36_s27), 0  ;;  %p298_p3 = pnand %p1485_p0, %p297_p2 }
   0x6   : > { %p352_p4 = scmp.lt.s32.totalorder (!%p298_p3), %s1784_s24, 1 }
   0x7   : > { %301 = sbr.rel (%p298_p3) target bundleno = 808 (0x328), region = 48 }
   0xc   : > { %s2239_s24 = smov (!%p352_p4, %s1784_s24), 1  ;;  %v1653_v11 = vld [vmem:[%s2229_s3 + $0xe4] ss:$16 sps:$4 sm:$0xff]   ;;  %v1655_v12 = vld [vmem:[%s2229_s3 + $0xec] ss:$16 sps:$4 sm:$0xff]   ;;  %v1794_v43 = vmov 0  }
   0xd   : > { %s1564_s28 = sshll.u32 %s2239_s24, 3  ;;  %v1657_v13 = vld [vmem:[%s2229_s3 + $0xe0] ss:$16 sps:$4 sm:$0xff]   ;;  %v1658_v14 = vld [vmem:[%s2229_s3 + $0xe8] ss:$16 sps:$4 sm:$0xff]   ;;  %681 = vmatprep.subr.bf16.mxu0 %v1653_v11  ;;  %724 = vmatprep.subr.bf16.mxu1 %v1655_v12 }
   0xe   : > { %s359_s8 = scalar_lea.vmem %s2226_s0, %s1564_s28  ;;  %682 = vmatpush1.bf16.msra.mxu0 %v1657_v13  ;;  %725 = vmatpush1.bf16.msra.mxu1 %v1658_v14  ;;  %v1659_v15 = vld [vmem:[%s2229_s3 + $0xc4] ss:$16 sps:$4 sm:$0xff]   ;;  %v1661_v16 = vld [vmem:[%s2229_s3 + $0xcc] ss:$16 sps:$4 sm:$0xff]   ;;  %v1663_v17 = vld [vmem:[%s2229_s3 + $0xc0] ss:$16 sps:$4 sm:$0xff]   ;;  %s386_s21 = scalar_lea.vmem %s2233_s7, %s1564_s28 }
   0xf   : > { %v1571_v0 = vld [vmem:[%s359_s8] sm:$0xff]   ;;  %v1664_v18 = vld [vmem:[%s2229_s3 + $0xc8] ss:$16 sps:$4 sm:$0xff]   ;;  %683 = vmatprep.subr.bf16.mxu0 %v1659_v15  ;;  %726 = vmatprep.subr.bf16.mxu1 %v1661_v16  ;;  %v1667_v20 = vld [vmem:[%s2229_s3 + $0xac] ss:$16 sps:$4 sm:$0xff]  }
  0x10   : > { %v1861_v1 = vunpack.c.l.bf16 %v1571_v0  ;;  %v1864_v2 = vunpack.c.h.bf16 %v1571_v0  ;;  %v1665_v19 = vld [vmem:[%s2229_s3 + $0xa4] ss:$16 sps:$4 sm:$0xff]   ;;  %v1669_v21 = vld [vmem:[%s2229_s3 + $0xa0] ss:$16 sps:$4 sm:$0xff]   ;;  %v1670_v22 = vld [vmem:[%s2229_s3 + $0xa8] ss:$16 sps:$4 sm:$0xff]   ;;  %713 = vmatprep.mubr.bf16.mxu0 %v1794_v43  ;;  %756 = vmatprep.mubr.bf16.mxu1 %v1794_v43 }
  0x11   : > { %v1671_v23 = vld [vmem:[%s2229_s3 + $0x84] ss:$16 sps:$4 sm:$0xff]   ;;  %v1673_v24 = vld [vmem:[%s2229_s3 + $0x8c] ss:$16 sps:$4 sm:$0xff]   ;;  %v1675_v25 = vld [vmem:[%s2229_s3 + $0x80] ss:$16 sps:$4 sm:$0xff]  }
  0x12   : > { %399 = vadd.xlane.f32.xlu0 %v1861_v1  ;;  %684 = vmatpush1.bf16.msra.mxu0 %v1663_v17  ;;  %v1676_v26 = vld [vmem:[%s2229_s3 + $0x88] ss:$16 sps:$4 sm:$0xff]   ;;  %v1677_v27 = vld [vmem:[%s2229_s3 + $0x64] ss:$16 sps:$4 sm:$0xff]   ;;  %v1679_v28 = vld [vmem:[%s2229_s3 + $0x6c] ss:$16 sps:$4 sm:$0xff]  }
  0x13   : > { %727 = vmatpush1.bf16.msra.mxu1 %v1664_v18  ;;  %685 = vmatprep.subr.bf16.mxu0 %v1665_v19  ;;  %v1681_v29 = vld [vmem:[%s2229_s3 + $0x60] ss:$16 sps:$4 sm:$0xff]   ;;  %v1682_v30 = vld [vmem:[%s2229_s3 + $0x68] ss:$16 sps:$4 sm:$0xff]   ;;  %v1683_v31 = vld [vmem:[%s2229_s3 + $0x44] ss:$16 sps:$4 sm:$0xff]  }
  0x14   : > { %728 = vmatprep.subr.bf16.mxu1 %v1667_v20  ;;  %v1685_v32 = vld [vmem:[%s2229_s3 + $0x4c] ss:$16 sps:$4 sm:$0xff]   ;;  %v1687_v33 = vld [vmem:[%s2229_s3 + $0x40] ss:$16 sps:$4 sm:$0xff]   ;;  %v1688_v34 = vld [vmem:[%s2229_s3 + $0x48] ss:$16 sps:$4 sm:$0xff]  }
  0x15   : > { %v1689_v35 = vld [vmem:[%s2229_s3 + $0x24] ss:$16 sps:$4 sm:$0xff]   ;;  %v1691_v36 = vld [vmem:[%s2229_s3 + $0x2c] ss:$16 sps:$4 sm:$0xff]   ;;  %v1693_v37 = vld [vmem:[%s2229_s3 + $0x20] ss:$16 sps:$4 sm:$0xff]  }
  0x16   : > { %401 = vadd.xlane.f32.xlu0 %v1864_v2  ;;  %686 = vmatpush1.bf16.msra.mxu0 %v1669_v21  ;;  %v1694_v38 = vld [vmem:[%s2229_s3 + $0x28] ss:$16 sps:$4 sm:$0xff]   ;;  %v1695_v39 = vld [vmem:[%s2229_s3 + $0x4] ss:$16 sps:$4 sm:$0xff]   ;;  %v1697_v40 = vld [vmem:[%s2229_s3 + $0xc] ss:$16 sps:$4 sm:$0xff]  }
  0x17   : > { %729 = vmatpush1.bf16.msra.mxu1 %v1670_v22  ;;  %687 = vmatprep.subr.bf16.mxu0 %v1671_v23  ;;  %v1699_v41 = vld [vmem:[%s2229_s3] ss:$16 sps:$4 sm:$0xff]   ;;  %v1700_v42 = vld [vmem:[%s2229_s3 + $0x8] ss:$16 sps:$4 sm:$0xff]  }
  0x18   : > { %730 = vmatprep.subr.bf16.mxu1 %v1673_v24  ;;  %v1490_v52 = vld [vmem:[%s2227_s1] ss:$0 sm:$0xff]  ;;  %v1702_v62 = vld [vmem:[%s2231_s5 + $0x78] sm:$0xff]   ;;  %v1713_v11 = vld [vmem:[%s2231_s5 + $0xa8] sm:$0xff]  }
  0x19   : > { %v1491_v56 = vld [vmem:[%s2228_s2] ss:$0 sm:$0xff]  ;;  %v1703_v63 = vld [vmem:[%s2231_s5 + $0xf8] sm:$0xff]   ;;  %v1722_v20 = vld [vmem:[%s2231_s5 + $0x50] sm:$0xff]  }
  0x1a   : > { %688 = vmatpush1.bf16.msra.mxu0 %v1675_v25  ;;  %v1704_v0 = vld [vmem:[%s2231_s5 + $0x38] sm:$0xff]   ;;  %v1714_v12 = vld [vmem:[%s2231_s5 + $0x60] sm:$0xff]   ;;  %v1723_v21 = vld [vmem:[%s2231_s5 + $0xd0] sm:$0xff]  }
  0x1b   : > { %731 = vmatpush1.bf16.msra.mxu1 %v1676_v26  ;;  %689 = vmatprep.subr.bf16.mxu0 %v1677_v27  ;;  %v1715_v13 = vld [vmem:[%s2231_s5 + $0xe0] sm:$0xff]   ;;  %v1718_v16 = vld [vmem:[%s2231_s5 + $0x58] sm:$0xff]   ;;  %v1724_v22 = vld [vmem:[%s2231_s5 + $0x10] sm:$0xff]  }
  0x1c   : > { %732 = vmatprep.subr.bf16.mxu1 %v1679_v28  ;;  %v1716_v14 = vld [vmem:[%s2231_s5 + $0x20] sm:$0xff]   ;;  %v1719_v17 = vld [vmem:[%s2231_s5 + $0xd8] sm:$0xff]   ;;  %v1725_v23 = vld [vmem:[%s2231_s5 + $0x90] sm:$0xff]  }
  0x1d   : > { %v1717_v15 = vld [vmem:[%s2231_s5 + $0xa0] sm:$0xff]   ;;  %v1720_v18 = vld [vmem:[%s2231_s5 + $0x18] sm:$0xff]   ;;  %v1726_v24 = vld [vmem:[%s2231_s5 + $0x48] sm:$0xff]  }
  0x1e   : > { %690 = vmatpush1.bf16.msra.mxu0 %v1681_v29  ;;  %v1721_v19 = vld [vmem:[%s2231_s5 + $0x98] sm:$0xff]   ;;  %v1727_v25 = vld [vmem:[%s2231_s5 + $0xc8] sm:$0xff]   ;;  %v1730_v28 = vld [vmem:[%s2231_s5 + $0x40] sm:$0xff]  }
  0x1f   : > { %733 = vmatpush1.bf16.msra.mxu1 %v1682_v30  ;;  %691 = vmatprep.subr.bf16.mxu0 %v1683_v31  ;;  %v1728_v26 = vld [vmem:[%s2231_s5 + $0x8] sm:$0xff]   ;;  %v1731_v29 = vld [vmem:[%s2231_s5 + $0xc0] sm:$0xff]  }
  0x20   : > { %734 = vmatprep.subr.bf16.mxu1 %v1685_v32  ;;  %v1729_v27 = vld [vmem:[%s2231_s5 + $0x88] sm:$0xff]   ;;  %v1732_v30 = vld [vmem:[%s2231_s5] sm:$0xff]   ;;  %v495_v32 = vlaneseq }
  0x21   : > { %v1733_v31 = vld [vmem:[%s2231_s5 + $0x80] sm:$0xff]  }
  0x22   : > { %692 = vmatpush1.bf16.msra.mxu0 %v1687_v33  ;;  %v496_v33 = vshrl.u32 %v495_v32, 7 }
  0x23   : > { %735 = vmatpush1.bf16.msra.mxu1 %v1688_v34  ;;  %693 = vmatprep.subr.bf16.mxu0 %v1689_v35 }
  0x24   : > { %736 = vmatprep.subr.bf16.mxu1 %v1691_v36  ;;  %v497_v34 = vsub.s32 0, %v496_v33  ;;  %v505_v35 = vsub.s32 2, %v496_v33  ;;  %v493_v36 = vld [vmem:[%s2230_s4] sm:$0xf] }
  0x26   : > { %694 = vmatpush1.bf16.msra.mxu0 %v1693_v37  ;;  %v501_v37 = vsub.s32 1, %v496_v33 }
  0x27   : > { %737 = vmatpush1.bf16.msra.mxu1 %v1694_v38  ;;  %695 = vmatprep.subr.bf16.mxu0 %v1695_v39  ;;  %v509_v38 = vsub.s32 3, %v496_v33  ;;  %v498_v39 = vrot.slane %v493_v36, %v497_v34 }
  0x28   : > { %738 = vmatprep.subr.bf16.mxu1 %v1697_v40  ;;  %v506_v40 = vrot.slane %v493_v36, %v505_v35  ;;  %v502_v43 = vrot.slane %v493_v36, %v501_v37 }
  0x2a   : > { %696 = vmatpush1.bf16.msra.mxu0 %v1699_v41 }
  0x2b   : > { %739 = vmatpush1.bf16.msra.mxu1 %v1700_v42  ;;  %1584 = vmatprep.subr.bf16.mxu0 %v1702_v62 }
  0x2c   : > { %1606 = vmatprep.subr.bf16.mxu1 %v1703_v63 }
  0x9b   : > { %v400_v3 = vpop.xlane.xlu0 %399 }
  0x9c   : > { %v404_v4 = vmul.f32 0.0078125, %v400_v3  ;;  %v1705_v3 = vld [vmem:[%s2231_s5 + $0xb8] sm:$0xff]  }
  0x9e   : > { %v1868_v5 = vsub.f32 %v1861_v1, %v404_v4  ;;  %v1706_v4 = vld [vmem:[%s2231_s5 + $0x70] sm:$0xff]  }
  0x9f   : > { %v402_v6 = vpop.xlane.xlu0 %401 }
  0xa0   : > { %v405_v7 = vmul.f32 0.0078125, %v402_v6  ;;  %v408_v8 = vmul.f32 %v1868_v5, %v1868_v5  ;;  %v1708_v6 = vld [vmem:[%s2231_s5 + $0x30] sm:$0xff]  }
  0xa2   : > { %v1873_v9 = vsub.f32 %v1864_v2, %v405_v7  ;;  %410 = vadd.xlane.f32.xlu1 %v408_v8  ;;  %v1709_v7 = vld [vmem:[%s2231_s5 + $0xb0] sm:$0xff]   ;;  %v1710_v8 = vld [vmem:[%s2231_s5 + $0x68] sm:$0xff]  }
  0xa4   : > { %v409_v10 = vmul.f32 %v1873_v9, %v1873_v9 }
  0xa6   : > { %412 = vadd.xlane.f32.xlu1 %v409_v10  ;;  %v1712_v10 = vld [vmem:[%s2231_s5 + $0x28] sm:$0xff]  }
 0x12b   : > { %v411_v44 = vpop.xlane.xlu1 %410 }
 0x12c   : > { %v414_v45 = vmul.f32 0.0078125, %v411_v44  ;;  %v510_v44 = vrot.slane %v493_v36, %v509_v38 }
 0x12e   : > { %v416_v46 = vadd.f32 1e-05, %v414_v45 }
 0x12f   : > { %v413_v47 = vpop.xlane.xlu1 %412 }
 0x130   : > { %1734 = vrsqrt.f32 %v416_v46  ;;  %v415_v48 = vmul.f32 0.0078125, %v413_v47 }
 0x132   : > { %v417_v49 = vadd.f32 1e-05, %v415_v48 }
 0x134   : > { %1736 = vrsqrt.f32 %v417_v49 }
 0x13d   : > { %v1735_v50 = vpop.eup %1734 }
 0x13e   : > { %v420_v51 = vmul.f32 %v1735_v50, %v1868_v5  ;;  %v1707_v5 = vld [vmem:[%s2231_s5 + $0xf0] sm:$0xff]  }
 0x140   : > { %v428_v54 = vmul.f32 %v1490_v52, %v420_v51 }
 0x141   : > { %v1737_v53 = vpop.eup %1736 }
 0x142   : > { %v421_v55 = vmul.f32 %v1737_v53, %v1873_v9  ;;  %v436_v58 = vadd.f32 %v1491_v56, %v428_v54  ;;  %v1711_v9 = vld [vmem:[%s2231_s5 + $0xe8] sm:$0xff]  }
 0x144   : > { %v429_v57 = vmul.f32 %v1490_v52, %v421_v55 }
 0x146   : > { %v437_v59 = vadd.f32 %v1491_v56, %v429_v57 }
 0x148   : > { %v1577_v60 = vpack.c.bf16 %v437_v59, %v436_v58 }
 0x14a   : > { %1578 = vst [vmem:[#allocation2] sm:$0xff] %v1577_v60  }
 0x151   : > { %v1701_v61 = vld [vmem:[#allocation2] sm:$0xff]  }
 0x152   : > { %714 = vmatmul.mubr.bf16.vlgmr.msra.gmra.mxu0 %v1701_v61  ;;  %757 = vmatmul.mubr.bf16.vlgmr.msra.gmra.mxu1 %v1701_v61 }
 0x153   : > { %1585 = vmatpush3.bf16.msra.mxu0 %v1704_v0  ;;  %1607 = vmatpush3.bf16.msra.mxu1 %v1705_v3 }
 0x154   : > { %1586 = vmatprep.subr.bf16.mxu0 %v1706_v4  ;;  %1608 = vmatprep.subr.bf16.mxu1 %v1707_v5 }
 0x157   : > { %1587 = vmatpush3.bf16.msra.mxu0 %v1708_v6  ;;  %1609 = vmatpush3.bf16.msra.mxu1 %v1709_v7 }
 0x158   : > { %1588 = vmatprep.subr.bf16.mxu0 %v1710_v8  ;;  %1610 = vmatprep.subr.bf16.mxu1 %v1711_v9 }
 0x15b   : > { %1589 = vmatpush3.bf16.msra.mxu0 %v1712_v10  ;;  %1611 = vmatpush3.bf16.msra.mxu1 %v1713_v11 }
 0x15c   : > { %1590 = vmatprep.subr.bf16.mxu0 %v1714_v12  ;;  %1612 = vmatprep.subr.bf16.mxu1 %v1715_v13 }
 0x15f   : > { %1591 = vmatpush3.bf16.msra.mxu0 %v1716_v14  ;;  %1613 = vmatpush3.bf16.msra.mxu1 %v1717_v15 }
 0x160   : > { %1592 = vmatprep.subr.bf16.mxu0 %v1718_v16  ;;  %1614 = vmatprep.subr.bf16.mxu1 %v1719_v17 }
 0x163   : > { %1593 = vmatpush3.bf16.msra.mxu0 %v1720_v18  ;;  %1615 = vmatpush3.bf16.msra.mxu1 %v1721_v19 }
 0x164   : > { %1594 = vmatprep.subr.bf16.mxu0 %v1722_v20  ;;  %1616 = vmatprep.subr.bf16.mxu1 %v1723_v21 }
 0x167   : > { %1595 = vmatpush3.bf16.msra.mxu0 %v1724_v22  ;;  %1617 = vmatpush3.bf16.msra.mxu1 %v1725_v23 }
 0x168   : > { %1596 = vmatprep.subr.bf16.mxu0 %v1726_v24  ;;  %1618 = vmatprep.subr.bf16.mxu1 %v1727_v25 }
 0x16b   : > { %1597 = vmatpush3.bf16.msra.mxu0 %v1728_v26  ;;  %1619 = vmatpush3.bf16.msra.mxu1 %v1729_v27 }
 0x16c   : > { %1598 = vmatprep.subr.bf16.mxu0 %v1730_v28  ;;  %1620 = vmatprep.subr.bf16.mxu1 %v1731_v29 }
 0x16f   : > { %1599 = vmatpush3.bf16.msra.mxu0 %v1732_v30  ;;  %1621 = vmatpush3.bf16.msra.mxu1 %v1733_v31 }
 0x212   : > { %v715_v41 = vpop.f32.mrf.mxu0  ;;  %v758_v42 = vpop.f32.mrf.mxu1 }
 0x213   : > { %v2080_v45 = vadd.f32 %v715_v41, %v498_v39  ;;  %v2082_v46 = vadd.f32 %v758_v42, %v506_v40 }
 0x214   : > { %v717_v47 = vpop.f32.mrf.mxu0  ;;  %v760_v48 = vpop.f32.mrf.mxu1 }
 0x215   : > { %v2085_v49 = vmul.f32 0.70710677, %v2080_v45  ;;  %v2088_v50 = vmul.f32 0.70710677, %v2082_v46  ;;  %v2090_v51 = vadd.f32 %v717_v47, %v502_v43  ;;  %v2092_v52 = vadd.f32 %v760_v48, %v510_v44 }
 0x216   : > { %v719_v59 = vpop.f32.mrf.mxu0  ;;  %v762_v5 = vpop.f32.mrf.mxu1 }
 0x217   : > { %v783_v53 = vand.u32 2147483647, %v2085_v49  ;;  %v785_v54 = vand.u32 2147483647, %v2088_v50  ;;  %v2097_v55 = vmul.f32 0.70710677, %v2090_v51  ;;  %v2104_v4 = vadd.f32 %v719_v59, %v498_v39 }
 0x218   : > { %v2100_v56 = vmul.f32 0.70710677, %v2092_v52  ;;  %v721_v6 = vpop.f32.mrf.mxu0  ;;  %v2109_v10 = vadd.f32 %v762_v5, %v506_v40  ;;  %v764_v13 = vpop.f32.mrf.mxu1  ;;  %vm943_vm1 = vcmp.lt.f32.partialorder %v2085_v49, 0.0  ;;  %vm945_vm3 = vcmp.lt.f32.partialorder %v2088_v50, 0.0 }
 0x219   : > { %v791_v57 = vmul.f32 0.3275911, %v783_v53  ;;  %v793_v58 = vmul.f32 0.3275911, %v785_v54  ;;  %v784_v60 = vand.u32 2147483647, %v2097_v55  ;;  %v2111_v11 = vadd.f32 %v721_v6, %v502_v43 }
 0x21a   : > { %v786_v61 = vand.u32 2147483647, %v2100_v56  ;;  %v2107_v9 = vmul.f32 0.70710677, %v2104_v4  ;;  %v2115_v14 = vmul.f32 0.70710677, %v2109_v10  ;;  %v2121_v18 = vadd.f32 %v764_v13, %v510_v44 }
 0x21b   : > { %v799_v62 = vadd.f32 1.0, %v791_v57  ;;  %v801_v63 = vadd.f32 1.0, %v793_v58  ;;  %v792_v0 = vmul.f32 0.3275911, %v784_v60  ;;  %v2118_v16 = vmul.f32 0.70710677, %v2111_v11 }
 0x21c   : > { %v794_v3 = vmul.f32 0.3275911, %v786_v61  ;;  %v787_v12 = vand.u32 2147483647, %v2107_v9  ;;  %v789_v17 = vand.u32 2147483647, %v2115_v14 }
 0x21d   : > { %1738 = vrcp.f32 %v799_v62  ;;  %v800_v7 = vadd.f32 1.0, %v792_v0  ;;  %v895_v19 = vsub.f32 0.0, %v783_v53  ;;  %v788_v21 = vand.u32 2147483647, %v2118_v16 }
 0x21e   : > { %1740 = vrcp.f32 %v801_v63  ;;  %v802_v8 = vadd.f32 1.0, %v794_v3  ;;  %v795_v15 = vmul.f32 0.3275911, %v787_v12  ;;  %v797_v22 = vmul.f32 0.3275911, %v789_v17 }
 0x21f   : > { %1742 = vrcp.f32 %v800_v7  ;;  %v2125_v23 = vmul.f32 0.70710677, %v2121_v18  ;;  %v897_v24 = vsub.f32 0.0, %v785_v54  ;;  %v796_v25 = vmul.f32 0.3275911, %v788_v21 }
 0x220   : > { %1744 = vrcp.f32 %v802_v8  ;;  %v803_v20 = vadd.f32 1.0, %v795_v15  ;;  %v896_v26 = vsub.f32 0.0, %v784_v60  ;;  %v805_v27 = vadd.f32 1.0, %v797_v22 }
 0x221   : > { %v2128_v28 = vand.u32 2147483647, %v2125_v23  ;;  %v903_v29 = vmul.f32 %v895_v19, %v783_v53  ;;  %v804_v30 = vadd.f32 1.0, %v796_v25  ;;  %v898_v32 = vsub.f32 0.0, %v786_v61 }
 0x222   : > { %1746 = vrcp.f32 %v803_v20  ;;  %v905_v36 = vmul.f32 %v897_v24, %v785_v54  ;;  %v904_v38 = vmul.f32 %v896_v26, %v784_v60  ;;  %v899_v39 = vsub.f32 0.0, %v787_v12 }
 0x223   : > { %1748 = vrcp.f32 %v805_v27  ;;  %v798_v33 = vmul.f32 0.3275911, %v2128_v28  ;;  %v911_v42 = vmul.f32 1.442695, %v903_v29  ;;  %v906_v47 = vmul.f32 %v898_v32, %v786_v61 }
 0x224   : > { %1750 = vrcp.f32 %v804_v30  ;;  %v901_v48 = vsub.f32 0.0, %v789_v17  ;;  %v915_v57 = vmul.f32 1.442695, %v905_v36  ;;  %v913_v60 = vmul.f32 1.442695, %v904_v38 }
 0x225   : > { %v806_v40 = vadd.f32 1.0, %v798_v33  ;;  %v907_v62 = vmul.f32 %v899_v39, %v787_v12  ;;  %v900_v63 = vsub.f32 0.0, %v788_v21  ;;  %v917_v6 = vmul.f32 1.442695, %v906_v47 }
 0x226   : > { %v909_v7 = vmul.f32 %v901_v48, %v789_v17  ;;  %v902_v29 = vsub.f32 0.0, %v2128_v28  ;;  %vm947_vm0 = vcmp.lt.f32.partialorder %v2107_v9, 0.0  ;;  %vm944_vm2 = vcmp.lt.f32.partialorder %v2097_v55, 0.0 }
 0x227   : > { %1752 = vrcp.f32 %v806_v40  ;;  %v919_v12 = vmul.f32 1.442695, %v907_v62  ;;  %v908_v22 = vmul.f32 %v900_v63, %v788_v21  ;;  %vm946_vm4 = vcmp.lt.f32.partialorder %v2100_v56, 0.0 }
 0x228   : > { %1754 = vpow2.f32 %v911_v42  ;;  %v923_v17 = vmul.f32 1.442695, %v909_v7  ;;  %v910_v48 = vmul.f32 %v902_v29, %v2128_v28  ;;  %vm949_vm5 = vcmp.lt.f32.partialorder %v2115_v14, 0.0 }
 0x229   : > { %1756 = vpow2.f32 %v915_v57  ;;  %v921_v42 = vmul.f32 1.442695, %v908_v22  ;;  %vm948_vm6 = vcmp.lt.f32.partialorder %v2118_v16, 0.0  ;;  %v767_v56 = vmul.f32 0.5, %v2080_v45 }
 0x22a   : > { %v2130_v31 = vpop.eup %1738  ;;  %1758 = vpow2.f32 %v913_v60  ;;  %vm950_vm7 = vcmp.lt.f32.partialorder %v2125_v23, 0.0  ;;  %v774_v50 = vmul.f32 0.5, %v2121_v18 }
 0x22b   : > { %v2133_v34 = vpop.eup %1740  ;;  %v823_v35 = vmul.f32 1.0614054, %v2130_v31  ;;  %1760 = vpow2.f32 %v917_v6 }
 0x22c   : > { %v825_v37 = vmul.f32 1.0614054, %v2133_v34  ;;  %v2137_v43 = vpop.eup %1742  ;;  %1762 = vpow2.f32 %v919_v12 }
 0x22d   : > { %v831_v41 = vadd.f32 -1.4531521, %v823_v35  ;;  %v824_v58 = vmul.f32 1.0614054, %v2137_v43  ;;  %v2141_v54 = vpop.eup %1744  ;;  %1764 = vpow2.f32 %v923_v17 }
 0x22e   : > { %v833_v44 = vadd.f32 -1.4531521, %v825_v37  ;;  %v826_v5 = vmul.f32 1.0614054, %v2141_v54  ;;  %1766 = vpow2.f32 %v921_v42 }
 0x22f   : > { %v839_v53 = vmul.f32 %v2130_v31, %v831_v41  ;;  %v832_v3 = vadd.f32 -1.4531521, %v824_v58  ;;  %v2147_v19 = vpop.eup %1746 }
 0x230   : > { %v841_v59 = vmul.f32 %v2133_v34, %v833_v44  ;;  %v834_v15 = vadd.f32 -1.4531521, %v826_v5  ;;  %v827_v27 = vmul.f32 1.0614054, %v2147_v19  ;;  %v2153_v30 = vpop.eup %1748 }
 0x231   : > { %v847_v0 = vadd.f32 1.4214138, %v839_v53  ;;  %v840_v13 = vmul.f32 %v2137_v43, %v832_v3  ;;  %v2157_v37 = vpop.eup %1750  ;;  %v829_v38 = vmul.f32 1.0614054, %v2153_v30 }
 0x232   : > { %v849_v61 = vadd.f32 1.4214138, %v841_v59  ;;  %v842_v26 = vmul.f32 %v2141_v54, %v834_v15  ;;  %v835_v36 = vadd.f32 -1.4531521, %v827_v27  ;;  %v828_v47 = vmul.f32 1.0614054, %v2157_v37 }
 0x233   : > { %v855_v8 = vmul.f32 %v2130_v31, %v847_v0  ;;  %v848_v25 = vadd.f32 1.4214138, %v840_v13  ;;  %v837_v44 = vadd.f32 -1.4531521, %v829_v38  ;;  %v925_v13 = vmul.f32 1.442695, %v910_v48 }
 0x234   : > { %v857_v20 = vmul.f32 %v2133_v34, %v849_v61  ;;  %v850_v35 = vadd.f32 1.4214138, %v842_v26  ;;  %v843_v41 = vmul.f32 %v2147_v19, %v835_v36  ;;  %v2164_v53 = vpop.eup %1752  ;;  %v836_v0 = vadd.f32 -1.4531521, %v828_v47 }
 0x235   : > { %v863_v24 = vadd.f32 -0.28449672, %v855_v8  ;;  %v856_v33 = vmul.f32 %v2137_v43, %v848_v25  ;;  %v845_v63 = vmul.f32 %v2153_v30, %v837_v44  ;;  %v830_v3 = vmul.f32 1.0614054, %v2164_v53  ;;  %v1755_v15 = vpop.eup %1754 }
 0x236   : > { %v865_v21 = vadd.f32 -0.28449672, %v857_v20  ;;  %v858_v40 = vmul.f32 %v2141_v54, %v850_v35  ;;  %v851_v60 = vadd.f32 1.4214138, %v843_v41  ;;  %v844_v7 = vmul.f32 %v2157_v37, %v836_v0  ;;  %v1757_v25 = vpop.eup %1756 }
 0x237   : > { %v871_v32 = vmul.f32 %v2130_v31, %v863_v24  ;;  %v864_v39 = vadd.f32 -0.28449672, %v856_v33  ;;  %v853_v28 = vadd.f32 1.4214138, %v845_v63  ;;  %v838_v8 = vadd.f32 -1.4531521, %v830_v3 }
 0x238   : > { %v866_v59 = vadd.f32 -0.28449672, %v858_v40  ;;  %v873_v62 = vmul.f32 %v2133_v34, %v865_v21  ;;  %v859_v6 = vmul.f32 %v2147_v19, %v851_v60  ;;  %v852_v17 = vadd.f32 1.4214138, %v844_v7 }
 0x239   : > { %v879_v57 = vadd.f32 0.2548296, %v871_v32  ;;  %v872_v58 = vmul.f32 %v2137_v43, %v864_v39  ;;  %v861_v27 = vmul.f32 %v2153_v30, %v853_v28  ;;  %v846_v29 = vmul.f32 %v2164_v53, %v838_v8  ;;  %v1759_v32 = vpop.eup %1758 }
 0x23a   : > { %v874_v61 = vmul.f32 %v2141_v54, %v866_v59  ;;  %v867_v24 = vadd.f32 -0.28449672, %v859_v6  ;;  %v881_v26 = vadd.f32 0.2548296, %v873_v62  ;;  %v860_v21 = vmul.f32 %v2157_v37, %v852_v17 }
 0x23b   : > { %v880_v5 = vadd.f32 0.2548296, %v872_v58  ;;  %v887_v20 = vmul.f32 %v2130_v31, %v879_v57  ;;  %v869_v36 = vadd.f32 -0.28449672, %v861_v27  ;;  %v854_v38 = vadd.f32 1.4214138, %v846_v29  ;;  %v1761_v31 = vpop.eup %1760 }
 0x23c   : > { %v882_v22 = vadd.f32 0.2548296, %v874_v61  ;;  %v875_v33 = vmul.f32 %v2147_v19, %v867_v24  ;;  %1768 = vpow2.f32 %v925_v13  ;;  %v889_v41 = vmul.f32 %v2133_v34, %v881_v26  ;;  %v1763_v47 = vpop.eup %1762 }
 0x23d   : > { %v888_v12 = vmul.f32 %v2137_v43, %v880_v5  ;;  %v927_v39 = vmul.f32 %v1755_v15, %v887_v20  ;;  %v877_v42 = vmul.f32 %v2153_v30, %v869_v36  ;;  %v868_v44 = vadd.f32 -0.28449672, %v860_v21  ;;  %v1765_v62 = vpop.eup %1764 }
 0x23e   : > { %v890_v43 = vmul.f32 %v2141_v54, %v882_v22  ;;  %v883_v40 = vadd.f32 0.2548296, %v875_v33  ;;  %v862_v60 = vmul.f32 %v2164_v53, %v854_v38  ;;  %v929_v3 = vmul.f32 %v1757_v25, %v889_v41  ;;  %v1767_v28 = vpop.eup %1766 }
 0x23f   : > { %v928_v35 = vmul.f32 %v1759_v32, %v888_v12  ;;  %v885_v58 = vadd.f32 0.2548296, %v877_v42  ;;  %v876_v59 = vmul.f32 %v2157_v37, %v868_v44  ;;  %v935_v63 = vsub.f32 1.0, %v927_v39 }
 0x240   : > { %v891_v48 = vmul.f32 %v2147_v19, %v883_v40  ;;  %v930_v0 = vmul.f32 %v1761_v31, %v890_v43  ;;  %v870_v61 = vadd.f32 -0.28449672, %v862_v60  ;;  %v937_v22 = vsub.f32 1.0, %v929_v3 }
 0x241   : > { %v936_v57 = vsub.f32 1.0, %v928_v35  ;;  %v893_v5 = vmul.f32 %v2153_v30, %v885_v58  ;;  %v884_v34 = vadd.f32 0.2548296, %v876_v59  ;;  %v951_v13 = vsub.f32 0.0, %v935_v63 }
 0x242   : > { %v931_v54 = vmul.f32 %v1763_v47, %v891_v48  ;;  %v938_v15 = vsub.f32 1.0, %v930_v0  ;;  %v878_v12 = vmul.f32 %v2164_v53, %v870_v61  ;;  %v768_v32 = vmul.f32 0.5, %v2090_v51 }
 0x243   : > { %v952_v7 = vsub.f32 0.0, %v936_v57  ;;  %v933_v8 = vmul.f32 %v1765_v62, %v893_v5  ;;  %v892_v19 = vmul.f32 %v2157_v37, %v884_v34  ;;  %v959_v29 = vsel %vm943_vm1, %v951_v13, %v935_v63 }
 0x244   : > { %v939_v6 = vsub.f32 1.0, %v931_v54  ;;  %v886_v26 = vadd.f32 0.2548296, %v878_v12  ;;  %v954_v33 = vsub.f32 0.0, %v938_v15  ;;  %v953_v36 = vsub.f32 0.0, %v937_v22 }
 0x245   : > { %v941_v24 = vsub.f32 1.0, %v933_v8  ;;  %v932_v25 = vmul.f32 %v1767_v28, %v892_v19  ;;  %v960_v27 = vsel %vm944_vm2, %v952_v7, %v936_v57  ;;  %v967_v31 = vadd.f32 1.0, %v959_v29 }
 0x246   : > { %v955_v20 = vsub.f32 0.0, %v939_v6  ;;  %v894_v35 = vmul.f32 %v2164_v53, %v886_v26  ;;  %v968_v55 = vadd.f32 1.0, %v960_v27  ;;  %v771_v39 = vmul.f32 0.5, %v2104_v4 }
 0x247   : > { %v957_v37 = vsub.f32 0.0, %v941_v24  ;;  %v940_v17 = vsub.f32 1.0, %v932_v25  ;;  %v962_v40 = vsel %vm946_vm4, %v954_v33, %v938_v15  ;;  %v772_v53 = vmul.f32 0.5, %v2111_v11 }
 0x248   : > { %v963_v30 = vsel %vm947_vm0, %v955_v20, %v939_v6  ;;  %v961_v44 = vsel %vm945_vm3, %v953_v36, %v937_v22  ;;  %v976_v14 = vmul.f32 %v968_v55, %v768_v32  ;;  %v975_v58 = vmul.f32 %v967_v31, %v767_v56 }
 0x249   : > { %v1769_v9 = vpop.eup %1768  ;;  %v971_v49 = vadd.f32 1.0, %v963_v30  ;;  %v956_v21 = vsub.f32 0.0, %v940_v17  ;;  %v965_v43 = vsel %vm949_vm5, %v957_v37, %v941_v24  ;;  %v970_v59 = vadd.f32 1.0, %v962_v40 }
 0x24a   : > { %v934_v38 = vmul.f32 %v1769_v9, %v894_v35  ;;  %v973_v48 = vadd.f32 1.0, %v965_v43  ;;  %v969_v4 = vadd.f32 1.0, %v961_v44  ;;  %v773_v60 = vmul.f32 0.5, %v2109_v10 }
 0x24b   : > { %v964_v51 = vsel %vm948_vm6, %v956_v21, %v940_v17  ;;  %v979_v47 = vmul.f32 %v971_v49, %v771_v39  ;;  %v770_v63 = vmul.f32 0.5, %v2092_v52  ;;  %v769_v54 = vmul.f32 0.5, %v2082_v46  ;;  %v1494_v46 = vld [vmem:[%s2232_s6] ss:$0 sm:$0xff] }
 0x24c   : > { %v972_v41 = vadd.f32 1.0, %v964_v51  ;;  %v942_v42 = vsub.f32 1.0, %v934_v38  ;;  %v981_v3 = vmul.f32 %v973_v48, %v773_v60  ;;  %v455_v22 = vadd.f32 %v1861_v1, %v1494_v46 }
 0x24d   : > { %v985_v45 = vpack.c.bf16 %v979_v47, %v975_v58  ;;  %v978_v5 = vmul.f32 %v970_v59, %v770_v63  ;;  %v977_v61 = vmul.f32 %v969_v4, %v769_v54  ;;  %v456_v25 = vadd.f32 %v1864_v2, %v1494_v46 }
 0x24e   : > { %v980_v16 = vmul.f32 %v972_v41, %v772_v53  ;;  %v958_v57 = vsub.f32 0.0, %v942_v42 }
 0x24f   : > { %v987_v6 = vpack.c.bf16 %v981_v3, %v977_v61 }
 0x250   : > { %v966_v11 = vsel %vm950_vm7, %v958_v57, %v942_v42  ;;  %v986_v62 = vpack.c.bf16 %v980_v16, %v976_v14 }
 0x251   : > { %v974_v0 = vadd.f32 1.0, %v966_v11 }
 0x252   : > { %1277 = vmatprep.mubr.bf16.mxu0 %v986_v62 }
 0x253   : > { %v982_v34 = vmul.f32 %v974_v0, %v774_v50  ;;  %1278 = vmatmul.mubr.bf16.vlgmr.msra.gmra.mxu0 %v985_v45 }
 0x255   : > { %v988_v23 = vpack.c.bf16 %v982_v34, %v978_v5 }
 0x257   : > { %1318 = vmatprep.mubr.bf16.mxu1 %v988_v23 }
 0x258   : > { %1319 = vmatmul.mubr.bf16.vlgmr.msra.gmra.mxu1 %v987_v6 }
 0x313   : > { %v1600_v10 = vpop.f32.mrf.mxu0 }
 0x315   : > { %v1601_v28 = vpop.f32.mrf.mxu0 }
 0x316   : > { %v1602_v19 = vadd.f32 %v1601_v28, %v1600_v10 }
 0x317   : > { %v1603_v7 = vpop.f32.mrf.mxu0 }
 0x318   : > { %v1622_v52 = vpop.f32.mrf.mxu1 }
 0x319   : > { %v1604_v18 = vpop.f32.mrf.mxu0 }
 0x31a   : > { %v1623_v8 = vpop.f32.mrf.mxu1  ;;  %v1605_v20 = vadd.f32 %v1604_v18, %v1603_v7 }
 0x31b   : > { %v1624_v13 = vadd.f32 %v1623_v8, %v1622_v52 }
 0x31c   : > { %v1625_v15 = vpop.f32.mrf.mxu1 }
 0x31d   : > { %v1321_v24 = vadd.f32 %v1624_v13, %v1602_v19 }
 0x31e   : > { %v1626_v12 = vpop.f32.mrf.mxu1 }
 0x31f   : > { %v1627_v30 = vadd.f32 %v1626_v12, %v1625_v15  ;;  %v1327_v27 = vadd.f32 %v1321_v24, %v455_v22 }
 0x321   : > { %v1324_v26 = vadd.f32 %v1627_v30, %v1605_v20 }
 0x323   : > { %v1328_v37 = vadd.f32 %v1324_v26, %v456_v25 }
 0x325   : > { %v1582_v17 = vpack.c.bf16 %v1328_v37, %v1327_v27 }
 0x327   : > { %1583 = vst [vmem:[%s386_s21] sm:$0xff] %v1582_v17  }
 0x328 PF: > { %s17_s26 = sadd.s32 1, %s1792_s26   ;;  %s2234_s24 = smov %s1788_s25 }
 0x329   : > { %p14_p5 = scmp.ge.s32.totalorder %s17_s26, 4   ;;  %s2235_s25 = smov %s2237_s27 }
 0x32b   :  { %16 = sbr.rel (!%p14_p5) target bundleno = 2 (0x2), region = 95 }

</bundles_post_ra>
